<compile_context>
chip_gen: v6e
topology: v6e:2x2x1
jax: 0.10.0
libtpu: 0.0.40
codegen_flags: <defaults>
</compile_context>

<pallas_src>
import functools

import jax
import jax.numpy as jnp
from jax import lax
from jax.experimental import pallas as pl
from jax.experimental.pallas import tpu as pltpu


# ----------------------------------------------------------------------------
# Kernels (channels-first: x tile is (P, tile_n); channels on sublanes,
# spatial positions on lanes).
# ----------------------------------------------------------------------------
def _phase0_kernel(x_ref, wqv_ref, bqv_ref, wc_ref, ma_ref, a_acc,
                   *, c, n_valid, compute_dtype):
    """Accumulate A = q @ v^T over spatial tiles; on the last tile apply the row
    softmax and fold it into the output projection: MA = W_comb @ softmax(A)^T."""
    t = pl.program_id(1)
    nt = pl.num_programs(1)
    tile_n = x_ref.shape[2]

    @pl.when(t == 0)
    def _init():
        a_acc[...] = jnp.zeros_like(a_acc)

    x = x_ref[0].astype(compute_dtype)                                 # (P, tn)
    # fused node_q / node_v 1x1 convs (bf16 MXU path, f32 accumulation)
    qv = jnp.dot(wqv_ref[...], x,
                 preferred_element_type=jnp.float32) + bqv_ref[...]    # (2C, tn)

    if n_valid is not None:          # static: only present when H*W was padded
        col = t * tile_n + lax.broadcasted_iota(jnp.int32, qv.shape, 1)
        qv = jnp.where(col < n_valid, qv, 0.0)

    q = qv[:c].astype(compute_dtype)                                   # (C, tn)
    v = qv[c:].astype(compute_dtype)                                   # (C, tn)
    # A[i, j] += sum_n q[i, n] * v[j, n]  (contract the spatial / lane axis;
    # the rhs-transposed dot may emit a small XLU transpose — hidden under MXU)
    a_acc[...] += lax.dot_general(q, v, (((1,), (1,)), ((), ())),
                                  preferred_element_type=jnp.float32)

    @pl.when(t == nt - 1)
    def _softmax_and_fold():
        a = a_acc[...]
        a = a - jnp.max(a, axis=-1, keepdims=True)
        e = jnp.exp(a)
        # approx reciprocal -> EUP slot, keeps the VALU free
        sm = e * pl.reciprocal(jnp.sum(e, axis=-1, keepdims=True), approx=True)
        # MA[p, i] = sum_j W_comb[p, j] * sm[i, j]   (tiny fold, once per batch)
        ma = lax.dot_general(wc_ref[...], sm, (((1,), (1,)), ((), ())),
                             preferred_element_type=jnp.float32)
        ma_ref[0] = ma.astype(ma_ref.dtype)


def _phase1_kernel(x_ref, wk_ref, bk_ref, ma_ref, bc_ref, o_ref,
                   *, compute_dtype):
    """k = Wk x + bk ; y = MA k + b_comb ; out = relu(y + x).
    Embarrassingly parallel over (batch, spatial tile)."""
    x = x_ref[0]                                          # (P, tn), input dtype
    xc = x.astype(compute_dtype)
    k = jnp.dot(wk_ref[...], xc,
                preferred_element_type=jnp.float32) + bk_ref[...]      # (C, tn)
    y = jnp.dot(ma_ref[0], k.astype(compute_dtype),
                preferred_element_type=jnp.float32) + bc_ref[...]      # (P, tn)
    o_ref[0] = jnp.maximum(y + x.astype(jnp.float32), 0.0).astype(o_ref.dtype)


# ----------------------------------------------------------------------------
# One-time weight preparation (hoisted out of the per-forward graph).
# ----------------------------------------------------------------------------
def prepare_spatial_gcn_params(params, *, eps=1e-5, compute_dtype=jnp.float32):
    f32 = jnp.float32
    wq = params['wq'].astype(f32)                    # (C, P) 1x1-conv weights
    wv = params['wv'].astype(f32)
    wk = params['wk'].astype(f32)
    # fused node_q / node_v conv: one (2C, P) matmul in the kernel
    wqv = jnp.concatenate([wq, wv], axis=0)
    bqv = jnp.concatenate([params['bq'], params['bv']]).astype(f32)
    # fold conv_wg + bn_wg + out-conv + bn_out (eval-mode BN) into (P, C) + bias
    s1 = params['bn_wg_gamma'] / jnp.sqrt(params['bn_wg_var'] + eps)
    t1 = params['bn_wg_beta'] - params['bn_wg_mean'] * s1
    s2 = params['bn_out_gamma'] / jnp.sqrt(params['bn_out_var'] + eps)
    w_comb = (s2[:, None] * params['wo'].astype(f32)) @ \
             (s1[:, None] * params['wg'].astype(f32))                   # (P, C)
    b_comb = s2 * (params['wo'].astype(f32) @ t1
                   + params['bo'] - params['bn_out_mean']) + params['bn_out_beta']
    return {
        'wqv': wqv.astype(compute_dtype),                 # (2C, P)
        'bqv': bqv.reshape(-1, 1),                        # (2C, 1) f32
        'wk': wk.astype(compute_dtype),                   # (C, P)
        'bk': params['bk'].astype(f32).reshape(-1, 1),    # (C, 1)  f32
        'w_comb': w_comb,                                 # (P, C)  f32 (tiny fold)
        'b_comb': b_comb.astype(f32).reshape(-1, 1),      # (P, 1)  f32
    }


# ----------------------------------------------------------------------------
# VMEM budgeting / tile selection.
# ----------------------------------------------------------------------------
def _device_vmem_bytes():
    try:
        return int(pltpu.get_tpu_info().vmem_capacity_bytes)
    except Exception:
        return 64 << 20          # conservative fallback (v7x per-TC VMEM)


def _vmem_need_bytes(tile_n, p, c, x_bytes, cd_bytes, out_bytes):
    return int(
        2 * tile_n * p * x_bytes            # x block, double-buffered
        + 2 * tile_n * p * out_bytes        # out block, double-buffered (phase 1)
        + 3 * c * p * cd_bytes              # Wqv + Wk (single-buffered weights)
        + 2 * p * c * (cd_bytes + 4)        # MA (dbl-buffered) + W_comb
        + c * c * 4                         # A accumulator scratch
        + 8 * tile_n * max(2 * c, p) * 4)   # in-flight f32 intermediates


def _choose_tile_n(n, p, c, x_bytes, cd_bytes, out_bytes, vmem_cap):
    budget = vmem_cap - (8 << 20)
    n128 = -(-n // 128) * 128
    best = 128
    for cand in (128, 256, 512, 1024, 2048):
        if cand > n128 and cand != 128:
            break
        if _vmem_need_bytes(cand, p, c, x_bytes, cd_bytes, out_bytes) <= budget:
            best = cand
    return best


# ----------------------------------------------------------------------------
# Launch helper + forward wrapper
# ----------------------------------------------------------------------------
def _launch(x_flat, prep, out_dtype, tile_n, t_tiles, n_valid, vmem_limit,
            single_buffer_weights):
    b, p, _ = x_flat.shape
    c = prep['wk'].shape[0]
    compute_dtype = prep['wqv'].dtype

    def const_spec(arr):
        # weights / biases: constant index map -> DMA'd once; single-buffer them
        # so they don't burn 2x VMEM (matters on v7x's 64 MiB per TensorCore).
        if single_buffer_weights:
            return pl.BlockSpec(arr.shape, lambda bi, ti: (0, 0),
                                pipeline_mode=pl.Buffered(1))
        return pl.BlockSpec(arr.shape, lambda bi, ti: (0, 0))

    x_spec = pl.BlockSpec((1, p, tile_n), lambda bi, ti: (bi, 0, ti))
    ma_spec = pl.BlockSpec((1, p, c), lambda bi, ti: (bi, 0, 0))

    # ---- phase 0: A accumulation, softmax, fold MA = W_comb @ softmax(A)^T --
    ma = pl.pallas_call(
        functools.partial(_phase0_kernel, c=c, n_valid=n_valid,
                          compute_dtype=compute_dtype),
        out_shape=jax.ShapeDtypeStruct((b, p, c), compute_dtype),
        grid_spec=pltpu.PrefetchScalarGridSpec(
            num_scalar_prefetch=0,
            grid=(b, t_tiles),                         # reduction axis last
            in_specs=[x_spec, const_spec(prep['wqv']), const_spec(prep['bqv']),
                      const_spec(prep['w_comb'])],
            out_specs=ma_spec,
            scratch_shapes=[pltpu.VMEM((c, c), jnp.float32)]),
        compiler_params=pltpu.CompilerParams(
            dimension_semantics=("parallel", "arbitrary"),
            vmem_limit_bytes=vmem_limit),
    )(x_flat, prep['wqv'], prep['bqv'], prep['w_comb'])

    # ---- phase 1: k, y = MA k + b, residual + relu (fully parallel) ---------
    out = pl.pallas_call(
        functools.partial(_phase1_kernel, compute_dtype=compute_dtype),
        out_shape=jax.ShapeDtypeStruct(x_flat.shape, out_dtype),
        grid_spec=pltpu.PrefetchScalarGridSpec(
            num_scalar_prefetch=0,
            grid=(b, t_tiles),
            in_specs=[x_spec, const_spec(prep['wk']), const_spec(prep['bk']),
                      ma_spec, const_spec(prep['b_comb'])],
            out_specs=pl.BlockSpec((1, p, tile_n), lambda bi, ti: (bi, 0, ti))),
        compiler_params=pltpu.CompilerParams(
            # both axes parallel: v7x megacore stays busy even for B == 1
            dimension_semantics=("parallel", "parallel"),
            vmem_limit_bytes=vmem_limit),
    )(x_flat, prep['wk'], prep['bk'], ma, prep['b_comb'])
    return out


_SINGLE_BUFFER_WEIGHTS = None     # resolved on first call (pl.Buffered(1) probe)


def spatial_gcn_pallas(x_nchw, prep, *, tile_n=None):
    """SpatialGCN forward. `prep` comes from prepare_spatial_gcn_params()."""
    global _SINGLE_BUFFER_WEIGHTS
    b, p, h, w = x_nchw.shape
    n = h * w
    c = prep['wk'].shape[0]
    assert prep['wk'].shape[1] == p

    compute_dtype = prep['wqv'].dtype
    out_dtype = x_nchw.dtype
    x_bytes = jnp.dtype(x_nchw.dtype).itemsize
    cd_bytes = jnp.dtype(compute_dtype).itemsize
    out_bytes = jnp.dtype(out_dtype).itemsize

    vmem_cap = _device_vmem_bytes()
    if tile_n is None:
        tile_n = _choose_tile_n(n, p, c, x_bytes, cd_bytes, out_bytes, vmem_cap)
    assert tile_n % 128 == 0

    n_pad = -(-n // tile_n) * tile_n
    t_tiles = n_pad // tile_n
    x_flat = x_nchw.reshape(b, p, n)           # free view of NCHW: no transpose
    if n_pad != n:
        x_flat = jnp.pad(x_flat, ((0, 0), (0, 0), (0, n_pad - n)))
    n_valid = n if n_pad != n else None        # static mask flag for phase 0

    need = _vmem_need_bytes(tile_n, p, c, x_bytes, cd_bytes, out_bytes)
    vmem_limit = int(min(vmem_cap - (4 << 20),
                         max(int(need * 1.5) + (4 << 20), 32 << 20)))

    args = (x_flat, prep, out_dtype, tile_n, t_tiles, n_valid, vmem_limit)
    if _SINGLE_BUFFER_WEIGHTS is None:
        try:
            out = _launch(*args, single_buffer_weights=True)
            jax.block_until_ready(out)         # one-time capability probe only
            _SINGLE_BUFFER_WEIGHTS = True
        except Exception:
            _SINGLE_BUFFER_WEIGHTS = False
            out = _launch(*args, single_buffer_weights=False)
    else:
        out = _launch(*args, single_buffer_weights=_SINGLE_BUFFER_WEIGHTS)

    if n_pad != n:
        out = out[:, :, :n]
    return out.reshape(b, p, h, w)


# ----------------------------------------------------------------------------
# Pure-JAX references
# ----------------------------------------------------------------------------
def spatial_gcn_ref(x, params, eps=1e-5):
    """Faithful mirror of the PyTorch forward (eval-mode BN)."""
    b, p, h, w = x.shape
    n = h * w
    xf = x.reshape(b, p, n)
    conv = lambda wm, bv: jnp.einsum('oc,bcn->bon', wm, xf) + bv[None, :, None]
    k = conv(params['wk'], params['bk'])
    v = conv(params['wv'], params['bv'])
    q = conv(params['wq'], params['bq'])
    node_k = jnp.transpose(k, (0, 2, 1))
    node_v = jnp.transpose(v, (0, 2, 1))
    av = jnp.einsum('bcn,bnd->bcd', q, node_v)
    av = jax.nn.softmax(av, axis=2)
    av = jnp.einsum('bnc,bcd->bnd', node_k, av)
    av = jnp.transpose(av, (0, 2, 1))                              # (b, c, n)
    avw = jnp.einsum('oc,bcn->bon', params['wg'], av)
    s1 = params['bn_wg_gamma'] / jnp.sqrt(params['bn_wg_var'] + eps)
    avw = (avw - params['bn_wg_mean'][None, :, None]) * s1[None, :, None] \
        + params['bn_wg_beta'][None, :, None]
    y = jnp.einsum('oc,bcn->bon', params['wo'], avw) + params['bo'][None, :, None]
    s2 = params['bn_out_gamma'] / jnp.sqrt(params['bn_out_var'] + eps)
    y = (y - params['bn_out_mean'][None, :, None]) * s2[None, :, None] \
        + params['bn_out_beta'][None, :, None]
    return jnp.maximum(y.reshape(b, p, h, w) + x, 0.0)


def spatial_gcn_ref_mirror(x, prep):
    """Mirror of the kernel math (same quantization points) — used to validate
    the low-precision (bf16) path tightly."""
    cd = prep['wqv'].dtype
    f32 = jnp.float32
    b, p, h, w = x.shape
    n = h * w
    c = prep['wk'].shape[0]
    xf = x.reshape(b, p, n)
    xc = xf.astype(cd)
    qv = jnp.einsum('op,bpn->bon', prep['wqv'], xc,
                    preferred_element_type=f32) + prep['bqv'][None]
    q = qv[:, :c].astype(cd)
    v = qv[:, c:].astype(cd)
    a = jnp.einsum('bin,bjn->bij', q, v, preferred_element_type=f32)
    a = jax.nn.softmax(a, axis=2)
    ma = jnp.einsum('pj,bij->bpi', prep['w_comb'], a).astype(cd)
    k = (jnp.einsum('cp,bpn->bcn', prep['wk'], xc,
                    preferred_element_type=f32) + prep['bk'][None]).astype(cd)
    y = jnp.einsum('bpc,bcn->bpn', ma, k,
                   preferred_element_type=f32) + prep['b_comb'][None]
    return jnp.maximum(y + xf.astype(f32), 0.0).reshape(b, p, h, w)


def init_params(key, plane):
    c = plane // 2
    ks = jax.random.split(key, 18)
    u = lambda k, shape, lo=-0.1, hi=0.1: jax.random.uniform(k, shape, jnp.float32, lo, hi)
    return {
        'wk': u(ks[0], (c, plane)), 'bk': u(ks[1], (c,)),
        'wv': u(ks[2], (c, plane)), 'bv': u(ks[3], (c,)),
        'wq': u(ks[4], (c, plane)), 'bq': u(ks[5], (c,)),
        'wg': u(ks[6], (c, c)),
        'bn_wg_gamma': u(ks[7], (c,), 0.5, 1.5),
        'bn_wg_beta': u(ks[8], (c,)),
        'bn_wg_mean': u(ks[9], (c,)),
        'bn_wg_var': u(ks[10], (c,), 0.5, 1.5),
        'wo': u(ks[11], (plane, c)), 'bo': u(ks[12], (plane,)),
        'bn_out_gamma': u(ks[13], (plane,), 0.5, 1.5),
        'bn_out_beta': u(ks[14], (plane,)),
        'bn_out_mean': u(ks[15], (plane,)),
        'bn_out_var': u(ks[16], (plane,), 0.5, 1.5),
    }


if __name__ == "__main__":
    key = jax.random.PRNGKey(0)
    kx, kp, kx3, kp3 = jax.random.split(key, 4)

    # --- test 1: f32, plane=128, 16x16 (N divisible by tile) ----------------
    B, PLANE, H, W = 2, 128, 16, 16
    x = jax.random.normal(kx, (B, PLANE, H, W), jnp.float32)        # NCHW
    params = init_params(kp, PLANE)
    prep = prepare_spatial_gcn_params(params)
    out = jax.block_until_ready(spatial_gcn_pallas(x, prep))
    ref = spatial_gcn_ref(x, params)
    assert out.shape == (B, PLANE, H, W)
    err = float(jnp.max(jnp.abs(out - ref)))
    assert jnp.allclose(out, ref, atol=1e-2, rtol=1e-2), \
        f"f32 mismatch vs reference (max abs err {err})"

    # --- test 2: bf16 MXU path vs a bf16-mirroring JAX reference ------------
    prep16 = prepare_spatial_gcn_params(params, compute_dtype=jnp.bfloat16)
    out16 = jax.block_until_ready(spatial_gcn_pallas(x, prep16))
    ref16 = spatial_gcn_ref_mirror(x, prep16)
    err16 = float(jnp.max(jnp.abs(out16 - ref16)))
    assert jnp.allclose(out16, ref16, atol=3e-2, rtol=3e-2), \
        f"bf16 mismatch vs mirrored reference (max abs err {err16})"

    # --- test 3: B=1, plane=96 (non-128 channels), 15x15 (padded+masked N) --
    B3, P3, H3, W3 = 1, 96, 15, 15
    x3 = jax.random.normal(kx3, (B3, P3, H3, W3), jnp.float32)
    params3 = init_params(kp3, P3)
    prep3 = prepare_spatial_gcn_params(params3)
    out3 = jax.block_until_ready(spatial_gcn_pallas(x3, prep3))
    ref3 = spatial_gcn_ref(x3, params3)
    err3 = float(jnp.max(jnp.abs(out3 - ref3)))
    assert jnp.allclose(out3, ref3, atol=1e-2, rtol=1e-2), \
        f"padded-N / B=1 mismatch vs reference (max abs err {err3})"

    print("KERNEL_OK")
</pallas_src>

<mosaic_0001>
module attributes {stable_mosaic.version = 11 : i64} {
  func.func @_phase0_kernel(%arg0: i32, %arg1: i32, %arg2: memref<1x128x256xf32, #tpu.memory_space<vmem>>, %arg3: memref<128x128xf32, #tpu.memory_space<vmem>>, %arg4: memref<128x1xf32, #tpu.memory_space<vmem>>, %arg5: memref<128x64xf32, #tpu.memory_space<vmem>>, %arg6: memref<1x128x64xf32, #tpu.memory_space<vmem>>, %arg7: memref<64x64xf32, #tpu.memory_space<vmem>>) attributes {dimension_semantics = [#tpu.dimension_semantics<parallel>, #tpu.dimension_semantics<arbitrary>], iteration_bounds = array<i64: 2, 1>, scalar_prefetch = 0 : i64, scratch_operands = 1 : i64, tpu.core_type = #tpu.core_type<tc>, window_params = [{transform_indices = @transform_0, window_bounds = array<i64: 1, 128, 256>}, {pipeline_mode = #tpu.pipeline_mode<synchronous>, transform_indices = @transform_1, window_bounds = array<i64: 128, 128>}, {pipeline_mode = #tpu.pipeline_mode<synchronous>, transform_indices = @transform_2, window_bounds = array<i64: 128, 1>}, {pipeline_mode = #tpu.pipeline_mode<synchronous>, transform_indices = @transform_3, window_bounds = array<i64: 128, 64>}, {transform_indices = @transform_4, window_bounds = array<i64: 1, 128, 64>}]} {
    %c0_i32 = arith.constant 0 : i32
    %0 = arith.cmpi eq, %arg1, %c0_i32 : i32
    %1 = arith.extui %0 : i1 to i32
    %c0_i32_0 = arith.constant 0 : i32
    %2 = arith.cmpi ne, %1, %c0_i32_0 : i32
    scf.if %2 {
      %cst_14 = arith.constant 0.000000e+00 : f32
      %19 = vector.broadcast %cst_14 : f32 to vector<64x64xf32>
      %c0_15 = arith.constant 0 : index
      %c0_16 = arith.constant 0 : index
      %20 = vector.load %arg7[%c0_15, %c0_16] : memref<64x64xf32, #tpu.memory_space<vmem>>, vector<64x64xf32>
      tpu.vector_store %arg7[%c0_15, %c0_16], %19 {strides = array<i32>} : memref<64x64xf32, #tpu.memory_space<vmem>>, vector<64x64xf32>,
    } else {
    }
    %c0 = arith.constant 0 : index
    %c0_1 = arith.constant 0 : index
    %c0_2 = arith.constant 0 : index
    %3 = vector.load %arg2[%c0, %c0_1, %c0_2] : memref<1x128x256xf32, #tpu.memory_space<vmem>>, vector<1x128x256xf32>
    %4 = vector.shape_cast %3 : vector<1x128x256xf32> to vector<128x256xf32>
    %c0_3 = arith.constant 0 : index
    %c0_4 = arith.constant 0 : index
    %5 = vector.load %arg3[%c0_3, %c0_4] : memref<128x128xf32, #tpu.memory_space<vmem>>, vector<128x128xf32>
    %cst = arith.constant dense<0.000000e+00> : vector<128x256xf32>
    %6 = tpu.matmul %5, %4, %cst {dimension_numbers = #tpu.dot_dimension_numbers<[1], [0], [0], [1], [0, 0, 1, 1], [], []>} : vector<128x128xf32>, vector<128x256xf32>, vector<128x256xf32> -> vector<128x256xf32>
    %c0_5 = arith.constant 0 : index
    %c0_6 = arith.constant 0 : index
    %7 = vector.load %arg4[%c0_5, %c0_6] : memref<128x1xf32, #tpu.memory_space<vmem>>, vector<128x1xf32>
    %8 = vector.broadcast %7 : vector<128x1xf32> to vector<128x256xf32>
    %9 = arith.addf %6, %8 : vector<128x256xf32>
    %10 = vector.extract_strided_slice %9 {offsets = [0, 0], sizes = [64, 256], strides = [1, 1]} : vector<128x256xf32> to vector<64x256xf32>
    %11 = vector.extract_strided_slice %9 {offsets = [64, 0], sizes = [64, 256], strides = [1, 1]} : vector<128x256xf32> to vector<64x256xf32>
    %c0_7 = arith.constant 0 : index
    %c0_8 = arith.constant 0 : index
    %12 = vector.load %arg7[%c0_7, %c0_8] : memref<64x64xf32, #tpu.memory_space<vmem>>, vector<64x64xf32>
    %cst_9 = arith.constant dense<0.000000e+00> : vector<64x64xf32>
    %13 = tpu.matmul %10, %11, %cst_9 {dimension_numbers = #tpu.dot_dimension_numbers<[1], [1], [0], [0], [0, 0, 1, 0], [], []>} : vector<64x256xf32>, vector<64x256xf32>, vector<64x64xf32> -> vector<64x64xf32>
    %14 = arith.addf %12, %13 : vector<64x64xf32>
    %c0_10 = arith.constant 0 : index
    %c0_11 = arith.constant 0 : index
    %15 = vector.load %arg7[%c0_10, %c0_11] : memref<64x64xf32, #tpu.memory_space<vmem>>, vector<64x64xf32>
    tpu.vector_store %arg7[%c0_10, %c0_11], %14 {strides = array<i32>} : memref<64x64xf32, #tpu.memory_space<vmem>>, vector<64x64xf32>,
    %c0_i32_12 = arith.constant 0 : i32
    %16 = arith.cmpi eq, %arg1, %c0_i32_12 : i32
    %17 = arith.extui %16 : i1 to i32
    %c0_i32_13 = arith.constant 0 : i32
    %18 = arith.cmpi ne, %17, %c0_i32_13 : i32
    scf.if %18 {
      %c0_14 = arith.constant 0 : index
      %c0_15 = arith.constant 0 : index
      %19 = vector.load %arg7[%c0_14, %c0_15] : memref<64x64xf32, #tpu.memory_space<vmem>>, vector<64x64xf32>
      %cst_16 = arith.constant dense<0xFF800000> : vector<64xf32>
      %20 = vector.multi_reduction <maximumf>, %19, %cst_16 [1] : vector<64x64xf32> to vector<64xf32>
      %21 = vector.shape_cast %20 : vector<64xf32> to vector<64x1xf32>
      %22 = vector.broadcast %21 : vector<64x1xf32> to vector<64x64xf32>
      %23 = arith.subf %19, %22 : vector<64x64xf32>
      %24 = math.exp %23 : vector<64x64xf32>
      %cst_17 = arith.constant dense<0.000000e+00> : vector<64xf32>
      %25 = vector.multi_reduction <add>, %24, %cst_17 [1] : vector<64x64xf32> to vector<64xf32>
      %26 = vector.shape_cast %25 : vector<64xf32> to vector<64x1xf32>
      %27 = tpu.reciprocal %26 {approx = true} : vector<64x1xf32> -> vector<64x1xf32>
      %28 = vector.broadcast %27 : vector<64x1xf32> to vector<64x64xf32>
      %29 = arith.mulf %24, %28 : vector<64x64xf32>
      %c0_18 = arith.constant 0 : index
      %c0_19 = arith.constant 0 : index
      %30 = vector.load %arg5[%c0_18, %c0_19] : memref<128x64xf32, #tpu.memory_space<vmem>>, vector<128x64xf32>
      %cst_20 = arith.constant dense<0.000000e+00> : vector<128x64xf32>
      %31 = tpu.matmul %30, %29, %cst_20 {dimension_numbers = #tpu.dot_dimension_numbers<[1], [1], [0], [0], [0, 0, 1, 0], [], []>} : vector<128x64xf32>, vector<64x64xf32>, vector<128x64xf32> -> vector<128x64xf32>
      %c0_21 = arith.constant 0 : index
      %c0_22 = arith.constant 0 : index
      %c0_23 = arith.constant 0 : index
      %32 = vector.load %arg6[%c0_21, %c0_22, %c0_23] : memref<1x128x64xf32, #tpu.memory_space<vmem>>, vector<1x128x64xf32>
      %33 = vector.shape_cast %32 : vector<1x128x64xf32> to vector<128x64xf32>
      %34 = vector.shape_cast %31 : vector<128x64xf32> to vector<1x128x64xf32>
      tpu.vector_store %arg6[%c0_21, %c0_22, %c0_23], %34 {strides = array<i32>} : memref<1x128x64xf32, #tpu.memory_space<vmem>>, vector<1x128x64xf32>,
    } else {
    }
    return
  }
  func.func @transform_0(%arg0: i32, %arg1: i32) -> (i32, i32, i32) {
    %c0_i32 = arith.constant 0 : i32
    %c0_i32_0 = arith.constant 0 : i32
    return %arg0, %c0_i32, %arg1 : i32, i32, i32
  }
  func.func @transform_1(%arg0: i32, %arg1: i32) -> (i32, i32) {
    %c0_i32 = arith.constant 0 : i32
    %c0_i32_0 = arith.constant 0 : i32
    %c0_i32_1 = arith.constant 0 : i32
    return %c0_i32, %c0_i32_0 : i32, i32
  }
  func.func @transform_2(%arg0: i32, %arg1: i32) -> (i32, i32) {
    %c0_i32 = arith.constant 0 : i32
    %c0_i32_0 = arith.constant 0 : i32
    %c0_i32_1 = arith.constant 0 : i32
    return %c0_i32, %c0_i32_0 : i32, i32
  }
  func.func @transform_3(%arg0: i32, %arg1: i32) -> (i32, i32) {
    %c0_i32 = arith.constant 0 : i32
    %c0_i32_0 = arith.constant 0 : i32
    %c0_i32_1 = arith.constant 0 : i32
    return %c0_i32, %c0_i32_0 : i32, i32
  }
  func.func @transform_4(%arg0: i32, %arg1: i32) -> (i32, i32, i32) {
    %c0_i32 = arith.constant 0 : i32
    %c0_i32_0 = arith.constant 0 : i32
    %c0_i32_1 = arith.constant 0 : i32
    return %arg0, %c0_i32, %c0_i32_0 : i32, i32, i32
  }
}

module attributes {stable_mosaic.version = 11 : i64} {
  func.func @_phase0_kernel(%arg0: i32, %arg1: i32, %arg2: memref<1x128x256xf32, #tpu.memory_space<vmem>>, %arg3: memref<128x128xf32, #tpu.memory_space<vmem>>, %arg4: memref<128x1xf32, #tpu.memory_space<vmem>>, %arg5: memref<128x64xf32, #tpu.memory_space<vmem>>, %arg6: memref<1x128x64xf32, #tpu.memory_space<vmem>>, %arg7: memref<64x64xf32, #tpu.memory_space<vmem>>) attributes {dimension_semantics = [#tpu.dimension_semantics<parallel>, #tpu.dimension_semantics<arbitrary>], iteration_bounds = array<i64: 2, 1>, scalar_prefetch = 0 : i64, scratch_operands = 1 : i64, tpu.core_type = #tpu.core_type<tc>, window_params = [{transform_indices = @transform_0, window_bounds = array<i64: 1, 128, 256>}, {pipeline_mode = #tpu.pipeline_mode<synchronous>, transform_indices = @transform_1, window_bounds = array<i64: 128, 128>}, {pipeline_mode = #tpu.pipeline_mode<synchronous>, transform_indices = @transform_2, window_bounds = array<i64: 128, 1>}, {pipeline_mode = #tpu.pipeline_mode<synchronous>, transform_indices = @transform_3, window_bounds = array<i64: 128, 64>}, {transform_indices = @transform_4, window_bounds = array<i64: 1, 128, 64>}]} {
    %c0_i32 = arith.constant 0 : i32
    %0 = arith.cmpi eq, %arg1, %c0_i32 : i32
    %1 = arith.extui %0 : i1 to i32
    %c0_i32_0 = arith.constant 0 : i32
    %2 = arith.cmpi ne, %1, %c0_i32_0 : i32
    scf.if %2 {
      %cst_14 = arith.constant 0.000000e+00 : f32
      %19 = vector.broadcast %cst_14 : f32 to vector<64x64xf32>
      %c0_15 = arith.constant 0 : index
      %c0_16 = arith.constant 0 : index
      %20 = vector.load %arg7[%c0_15, %c0_16] : memref<64x64xf32, #tpu.memory_space<vmem>>, vector<64x64xf32>
      tpu.vector_store %arg7[%c0_15, %c0_16], %19 {strides = array<i32>} : memref<64x64xf32, #tpu.memory_space<vmem>>, vector<64x64xf32>,
    } else {
    }
    %c0 = arith.constant 0 : index
    %c0_1 = arith.constant 0 : index
    %c0_2 = arith.constant 0 : index
    %3 = vector.load %arg2[%c0, %c0_1, %c0_2] : memref<1x128x256xf32, #tpu.memory_space<vmem>>, vector<1x128x256xf32>
    %4 = vector.shape_cast %3 : vector<1x128x256xf32> to vector<128x256xf32>
    %c0_3 = arith.constant 0 : index
    %c0_4 = arith.constant 0 : index
    %5 = vector.load %arg3[%c0_3, %c0_4] : memref<128x128xf32, #tpu.memory_space<vmem>>, vector<128x128xf32>
    %cst = arith.constant dense<0.000000e+00> : vector<128x256xf32>
    %6 = tpu.matmul %5, %4, %cst {dimension_numbers = #tpu.dot_dimension_numbers<[1], [0], [0], [1], [0, 0, 1, 1], [], []>} : vector<128x128xf32>, vector<128x256xf32>, vector<128x256xf32> -> vector<128x256xf32>
    %c0_5 = arith.constant 0 : index
    %c0_6 = arith.constant 0 : index
    %7 = vector.load %arg4[%c0_5, %c0_6] : memref<128x1xf32, #tpu.memory_space<vmem>>, vector<128x1xf32>
    %8 = vector.broadcast %7 : vector<128x1xf32> to vector<128x256xf32>
    %9 = arith.addf %6, %8 : vector<128x256xf32>
    %10 = vector.extract_strided_slice %9 {offsets = [0, 0], sizes = [64, 256], strides = [1, 1]} : vector<128x256xf32> to vector<64x256xf32>
    %11 = vector.extract_strided_slice %9 {offsets = [64, 0], sizes = [64, 256], strides = [1, 1]} : vector<128x256xf32> to vector<64x256xf32>
    %c0_7 = arith.constant 0 : index
    %c0_8 = arith.constant 0 : index
    %12 = vector.load %arg7[%c0_7, %c0_8] : memref<64x64xf32, #tpu.memory_space<vmem>>, vector<64x64xf32>
    %cst_9 = arith.constant dense<0.000000e+00> : vector<64x64xf32>
    %13 = tpu.matmul %10, %11, %cst_9 {dimension_numbers = #tpu.dot_dimension_numbers<[1], [1], [0], [0], [0, 0, 1, 0], [], []>} : vector<64x256xf32>, vector<64x256xf32>, vector<64x64xf32> -> vector<64x64xf32>
    %14 = arith.addf %12, %13 : vector<64x64xf32>
    %c0_10 = arith.constant 0 : index
    %c0_11 = arith.constant 0 : index
    %15 = vector.load %arg7[%c0_10, %c0_11] : memref<64x64xf32, #tpu.memory_space<vmem>>, vector<64x64xf32>
    tpu.vector_store %arg7[%c0_10, %c0_11], %14 {strides = array<i32>} : memref<64x64xf32, #tpu.memory_space<vmem>>, vector<64x64xf32>,
    %c0_i32_12 = arith.constant 0 : i32
    %16 = arith.cmpi eq, %arg1, %c0_i32_12 : i32
    %17 = arith.extui %16 : i1 to i32
    %c0_i32_13 = arith.constant 0 : i32
    %18 = arith.cmpi ne, %17, %c0_i32_13 : i32
    scf.if %18 {
      %c0_14 = arith.constant 0 : index
      %c0_15 = arith.constant 0 : index
      %19 = vector.load %arg7[%c0_14, %c0_15] : memref<64x64xf32, #tpu.memory_space<vmem>>, vector<64x64xf32>
      %cst_16 = arith.constant dense<0xFF800000> : vector<64xf32>
      %20 = vector.multi_reduction <maximumf>, %19, %cst_16 [1] : vector<64x64xf32> to vector<64xf32>
      %21 = vector.shape_cast %20 : vector<64xf32> to vector<64x1xf32>
      %22 = vector.broadcast %21 : vector<64x1xf32> to vector<64x64xf32>
      %23 = arith.subf %19, %22 : vector<64x64xf32>
      %24 = math.exp %23 : vector<64x64xf32>
      %cst_17 = arith.constant dense<0.000000e+00> : vector<64xf32>
      %25 = vector.multi_reduction <add>, %24, %cst_17 [1] : vector<64x64xf32> to vector<64xf32>
      %26 = vector.shape_cast %25 : vector<64xf32> to vector<64x1xf32>
      %27 = tpu.reciprocal %26 {approx = true} : vector<64x1xf32> -> vector<64x1xf32>
      %28 = vector.broadcast %27 : vector<64x1xf32> to vector<64x64xf32>
      %29 = arith.mulf %24, %28 : vector<64x64xf32>
      %c0_18 = arith.constant 0 : index
      %c0_19 = arith.constant 0 : index
      %30 = vector.load %arg5[%c0_18, %c0_19] : memref<128x64xf32, #tpu.memory_space<vmem>>, vector<128x64xf32>
      %cst_20 = arith.constant dense<0.000000e+00> : vector<128x64xf32>
      %31 = tpu.matmul %30, %29, %cst_20 {dimension_numbers = #tpu.dot_dimension_numbers<[1], [1], [0], [0], [0, 0, 1, 0], [], []>} : vector<128x64xf32>, vector<64x64xf32>, vector<128x64xf32> -> vector<128x64xf32>
      %c0_21 = arith.constant 0 : index
      %c0_22 = arith.constant 0 : index
      %c0_23 = arith.constant 0 : index
      %32 = vector.load %arg6[%c0_21, %c0_22, %c0_23] : memref<1x128x64xf32, #tpu.memory_space<vmem>>, vector<1x128x64xf32>
      %33 = vector.shape_cast %32 : vector<1x128x64xf32> to vector<128x64xf32>
      %34 = vector.shape_cast %31 : vector<128x64xf32> to vector<1x128x64xf32>
      tpu.vector_store %arg6[%c0_21, %c0_22, %c0_23], %34 {strides = array<i32>} : memref<1x128x64xf32, #tpu.memory_space<vmem>>, vector<1x128x64xf32>,
    } else {
    }
    return
  }
  func.func @transform_0(%arg0: i32, %arg1: i32) -> (i32, i32, i32) {
    %c0_i32 = arith.constant 0 : i32
    %c0_i32_0 = arith.constant 0 : i32
    return %arg0, %c0_i32, %arg1 : i32, i32, i32
  }
  func.func @transform_1(%arg0: i32, %arg1: i32) -> (i32, i32) {
    %c0_i32 = arith.constant 0 : i32
    %c0_i32_0 = arith.constant 0 : i32
    %c0_i32_1 = arith.constant 0 : i32
    return %c0_i32, %c0_i32_0 : i32, i32
  }
  func.func @transform_2(%arg0: i32, %arg1: i32) -> (i32, i32) {
    %c0_i32 = arith.constant 0 : i32
    %c0_i32_0 = arith.constant 0 : i32
    %c0_i32_1 = arith.constant 0 : i32
    return %c0_i32, %c0_i32_0 : i32, i32
  }
  func.func @transform_3(%arg0: i32, %arg1: i32) -> (i32, i32) {
    %c0_i32 = arith.constant 0 : i32
    %c0_i32_0 = arith.constant 0 : i32
    %c0_i32_1 = arith.constant 0 : i32
    return %c0_i32, %c0_i32_0 : i32, i32
  }
  func.func @transform_4(%arg0: i32, %arg1: i32) -> (i32, i32, i32) {
    %c0_i32 = arith.constant 0 : i32
    %c0_i32_0 = arith.constant 0 : i32
    %c0_i32_1 = arith.constant 0 : i32
    return %arg0, %c0_i32, %c0_i32_0 : i32, i32, i32
  }
}

</mosaic_0001>

<bundles_post_ra>
// kernel: tpu_custom_call.1
= control target key start
LH: loop header
LB: loop body
LE: loop exit
PB: predicated region body
PF: predicated region fallthrough
CT: control target
= control target key end

     0   :  { %9 = vsyncpa [#allocation4], 0  ;;  %s1868_s0 = inlined_call_operand.hbm [shape: f32[2,128,256], index: 0, kind: input, shape index: {}]   ;;  %s1869_s1 = inlined_call_operand.vmem [shape: f32[128,128], index: 1, kind: input, shape index: {}]   ;;  %s1870_s2 = inlined_call_operand.vmem [shape: f32[128,1], index: 2, kind: input, shape index: {}]   ;;  %s1871_s3 = inlined_call_operand.vmem [shape: f32[128,64], index: 3, kind: input, shape index: {}]   ;;  %s1872_s4 = inlined_call_operand.vmem [shape: f32[2,128,64], index: 4, kind: output, shape index: {}]  }
   0x1   :  { %11 = vsyncpa [#allocation4 + $0x1], 0  ;;  %s1415_s15 = smov 0   ;;  %s1417_s16 = smov 0  }
   0x2   :  { %s1419_s17 = smov 0   ;;  %s1421_s18 = smov 0  }
   0x3   :  { %s1423_s19 = smov 0   ;;  %s1425_s20 = smov 0  }
   0x4 LB: > { %s1109_s21 = sadd.s32 4294967295, %s1383_s20   ;;  %s29_s22 = sadd.s32 1, %s1379_s19  ;;  %s1383_s20 = sphi %s1425_s20, %s17_s20   ;;  %s1379_s19 = sphi %s1423_s19, %s1880_s19   ;;  %s1375_s18 = sphi %s1421_s18, %s1879_s18   ;;  %s1371_s17 = sphi %s1419_s17, %s1878_s17   ;;  %s1367_s16 = sphi %s1417_s16, %s1877_s16   ;;  %s1363_s15 = sphi %s1415_s15, %s1876_s15  }
   0x5   : > { %p31_p0 = scmp.ge.s32.totalorder %s29_s22, 2  ;;  %s38_s23 = sadd.s32 1, %s1371_s17 }
   0x6   : > { %p45_p1 = scmp.ne.s32.totalorder %s1371_s17, %s1367_s16  ;;  %p46_p2 = scmp.eq.s32.totalorder %s1383_s20, 0 }
   0x7   : > { %s1882_s22 = smov (%p31_p0, %s29_s22), 0  ;;  %p51_p4 = scmp.ne.s32.totalorder %s1367_s16, %s1363_s15 }
   0x8   : > { %p1451_p3 = por %p46_p2, %p45_p1  ;;  %s33_s25 = ssub.s32 %s1379_s19, %s1882_s22 }
   0x9   : > { %p52_p5 = scmp.eq.s32.totalorder %s1109_s21, 0  ;;  %p36_p6 = scmp.eq.s32.totalorder %s33_s25, 0 }
   0xa   : > { %p1218_p8 = scmp.lt.s32.totalorder %s1383_s20, 2  ;;  %s173_s28 = sand.u32 1, %s1371_s17  }
   0xb   : > { %p1458_p7 = por %p52_p5, %p51_p4  ;;  %s1146_s29 = sshll.u32 %s1379_s19, 12 }
   0xc   : > { %s1464_s27 = scalar_select %p36_p6, %s1371_s17, %s38_s23  }
   0xd   : > { %s1113_s30 = sshll.u32 %s173_s28, 8  ;;  %s185_s7 = scalar_lea.hbm %s1868_s0, %s1146_s29 }
   0xe   : > { %s177_s8 = scalar_lea.vmem [#allocation3], %s1113_s30  ;;  %p1473_p9 = pnand %p1218_p8, %p1451_p3 }
   0xf   : > { %s186_s9 = sshll.u32 %s177_s8, 4  ;;  %s174_s11 = scalar_lea.sflag [#allocation4], %s173_s28  ;;  %s187_s9 = int_to_ptr.vmem [resolvable:$true] %s186_s9 }
  0x10   : > { %p1307_p10 = pneg %p1473_p9  ;;  %s1318_s12 = scalar_lea.vmem %s187_s9, 4096 }
  0x11   : > { %p1319_p11 = scmp.ne.s32.totalorder %s187_s9, %s1318_s12  ;;  %s1385_s13 = smov [#allocation3]  }
  0x12   : > { %s1323_s14 = sshll.u32 %s1385_s13, 4  ;;  %s1324_s14 = int_to_ptr.vmem [resolvable:$false] %s1323_s14 }
  0x13   : > { %p1321_p12 = pnand %p1319_p11, %p1307_p10  ;;  %s1325_s15 = scalar_lea.vmem %s1324_s14, 8192 }
  0x14   : > { %p1326_p0 = scmp.lt.s32.totalorder %s187_s9, %s1324_s14  ;;  %p1327_p1 = scmp.lt.s32.totalorder %s1325_s15, %s1318_s12 }
  0x15   : > { %p1322_p13 = pneg %p1321_p12 }
  0x16   : > { %p1328_p2 = por %p1327_p1, %p1326_p0 }
  0x18   : > { %p1329_p3 = pnand %p1328_p2, %p1322_p13 }
  0x1a   : > { %1332 = shalt.err (!%p1329_p3)
}
  0x1b   : > { %s1386_s21 = smov 256   ;;  %s1387_s23 = smov 16  }
  0x1c   : > { %1217 = dma.hbm_to_vmem [thread:$0]  (!%p1473_p9), %s185_s7, 4096, %s187_s9, %s174_s11, %s1386_s21, %s1386_s21, %s1387_s23  }
  0x1d   : > { %p1116_p4 = scmp.ge.s32.totalorder %s1383_s20, 1  ;;  %p194_p5 = scmp.lt.s32.totalorder %s1383_s20, 3 }
  0x1f   : > { %p195_p6 = pnand %p1116_p4, %p194_p5 }
  0x20   : > { %s200_s24 = sand.u32 (!%p195_p6), 1, %s1367_s16  }
  0x21   : > { %198 = sbr.rel (%p195_p6) target bundleno = 1161 (0x489), region = 36  ;;  %s1117_s25 = sshll.u32 (!%p195_p6), %s200_s24, 8 }
  0x22   : > { %s201_s28 = scalar_lea.sflag (!%p195_p6), [#allocation4], %s200_s24  ;;  %s1484_s29 = scalar_lea.vmem (!%p195_p6), [#allocation3], %s1117_s25 }
  0x26   : > { %1358 = dma.done.wait (%p1458_p7), %s201_s28, 4096  }
  0x27   : > { %1360 = vsyncadd (%p1458_p7), %s201_s28, 4294963200  ;;  %v1388_v0 = vmov 0.0   ;;  %v1389_v1 = vmov 0   ;;  %v279_v2 = vld [vmem:[%s1484_s29 + $0xf8] sm:$0xff]  ;;  %v278_v3 = vld [vmem:[%s1484_s29 + $0xf0] sm:$0xff]  ;;  %vm239_vm0 = vcmask 523264  }
  0x28   : > { %456 = vmatprep.mubr.f32.mxu0 %v1388_v0  ;;  %1271 = vset.pattern.permute.xlu0 %v1389_v1  ;;  %v277_v4 = vld [vmem:[%s1484_s29 + $0xe8] sm:$0xff]  ;;  %v276_v5 = vld [vmem:[%s1484_s29 + $0xe0] sm:$0xff]  ;;  %v275_v6 = vld [vmem:[%s1484_s29 + $0xd8] sm:$0xff]  ;;  %240 = vst.msk [vmem:[#allocation2] sm:$0xff] %vm239_vm0, %v1388_v0  ;;  %p230_p7 = scmp.lt.s32.totalorder %s1375_s18, 1 }
  0x29   : > { %1272 = vset.pattern.permute.xlu1 %v1389_v1  ;;  %392 = vmatprep.subr.mxu0 %v279_v2  ;;  %v274_v7 = vld [vmem:[%s1484_s29 + $0xd0] sm:$0xff]  ;;  %v273_v8 = vld [vmem:[%s1484_s29 + $0xc8] sm:$0xff]  ;;  %v272_v9 = vld [vmem:[%s1484_s29 + $0xc0] sm:$0xff]  ;;  %241 = vst.msk [vmem:[#allocation2 + $0x8] sm:$0xff] %vm239_vm0, %v1388_v0 }
  0x2a   : > { %393 = vmatpush1.msra.mxu0 %v278_v3  ;;  %v271_v10 = vld [vmem:[%s1484_s29 + $0xb8] sm:$0xff]  ;;  %v270_v11 = vld [vmem:[%s1484_s29 + $0xb0] sm:$0xff]  ;;  %v269_v12 = vld [vmem:[%s1484_s29 + $0xa8] sm:$0xff]  ;;  %242 = vst.msk [vmem:[#allocation2 + $0x10] sm:$0xff] %vm239_vm0, %v1388_v0  ;;  %s1884_s18 = smov (!%p230_p7, %s1375_s18), 1 }
  0x2b   : > { %394 = vmatprep.subr.mxu0 %v277_v4  ;;  %v268_v13 = vld [vmem:[%s1484_s29 + $0xa0] sm:$0xff]  ;;  %v267_v14 = vld [vmem:[%s1484_s29 + $0x98] sm:$0xff]  ;;  %v266_v15 = vld [vmem:[%s1484_s29 + $0x90] sm:$0xff]  ;;  %243 = vst.msk [vmem:[#allocation2 + $0x18] sm:$0xff] %vm239_vm0, %v1388_v0  ;;  %s1147_s5 = sshll.u32 %s1884_s18, 7 }
  0x2c   : > { %395 = vmatpush1.msra.mxu0 %v276_v5  ;;  %v265_v16 = vld [vmem:[%s1484_s29 + $0x88] sm:$0xff]  ;;  %v264_v17 = vld [vmem:[%s1484_s29 + $0x80] sm:$0xff]  ;;  %v263_v18 = vld [vmem:[%s1484_s29 + $0x78] sm:$0xff]  ;;  %244 = vst.msk [vmem:[#allocation2 + $0x20] sm:$0xff] %vm239_vm0, %v1388_v0  ;;  %s1816_s7 = scalar_lea.vmem %s1872_s4, %s1147_s5 }
  0x2d   : > { %396 = vmatprep.subr.mxu0 %v275_v6  ;;  %v262_v19 = vld [vmem:[%s1484_s29 + $0x70] sm:$0xff]  ;;  %v311_v20 = vld [vmem:[%s1870_s2 + $0x78] sm:$0xff]  ;;  %v261_v21 = vld [vmem:[%s1484_s29 + $0x68] sm:$0xff]  ;;  %245 = vst.msk [vmem:[#allocation2 + $0x28] sm:$0xff] %vm239_vm0, %v1388_v0 }
  0x2e   : > { %397 = vmatpush1.msra.mxu0 %v274_v7  ;;  %389 = vperm.xlu0 %1271, %v311_v20   ;;  %v309_v22 = vld [vmem:[%s1870_s2 + $0x68] sm:$0xff]  ;;  %v260_v23 = vld [vmem:[%s1484_s29 + $0x60] sm:$0xff]  ;;  %v310_v24 = vld [vmem:[%s1870_s2 + $0x70] sm:$0xff]  ;;  %246 = vst.msk [vmem:[#allocation2 + $0x30] sm:$0xff] %vm239_vm0, %v1388_v0 }
  0x2f   : > { %398 = vmatprep.subr.mxu0 %v273_v8  ;;  %379 = vperm.xlu1 %1272, %v309_v22   ;;  %v259_v25 = vld [vmem:[%s1484_s29 + $0x58] sm:$0xff]  ;;  %v308_v26 = vld [vmem:[%s1870_s2 + $0x60] sm:$0xff]  ;;  %v258_v27 = vld [vmem:[%s1484_s29 + $0x50] sm:$0xff]  ;;  %247 = vst.msk [vmem:[#allocation2 + $0x38] sm:$0xff] %vm239_vm0, %v1388_v0 }
  0x30   : > { %399 = vmatpush1.msra.mxu0 %v272_v9  ;;  %v257_v28 = vld [vmem:[%s1484_s29 + $0x48] sm:$0xff]  ;;  %v256_v29 = vld [vmem:[%s1484_s29 + $0x40] sm:$0xff]  ;;  %v307_v30 = vld [vmem:[%s1870_s2 + $0x58] sm:$0xff] }
  0x31   : > { %400 = vmatprep.subr.mxu0 %v271_v10  ;;  %v255_v31 = vld [vmem:[%s1484_s29 + $0x38] sm:$0xff]  ;;  %v306_v32 = vld [vmem:[%s1870_s2 + $0x50] sm:$0xff]  ;;  %v253_v34 = vld [vmem:[%s1484_s29 + $0x28] sm:$0xff] }
  0x32   : > { %401 = vmatpush1.msra.mxu0 %v270_v11  ;;  %384 = vperm.xlu0 %1271, %v310_v24   ;;  %v254_v33 = vld [vmem:[%s1484_s29 + $0x30] sm:$0xff]  ;;  %v252_v35 = vld [vmem:[%s1484_s29 + $0x20] sm:$0xff]  ;;  %v305_v36 = vld [vmem:[%s1870_s2 + $0x48] sm:$0xff] }
  0x33   : > { %402 = vmatprep.subr.mxu0 %v269_v12  ;;  %374 = vperm.xlu1 %1272, %v308_v26   ;;  %v251_v37 = vld [vmem:[%s1484_s29 + $0x18] sm:$0xff]  ;;  %v304_v38 = vld [vmem:[%s1870_s2 + $0x40] sm:$0xff]  ;;  %v250_v39 = vld [vmem:[%s1484_s29 + $0x10] sm:$0xff] }
  0x34   : > { %403 = vmatpush1.msra.mxu0 %v268_v13  ;;  %v249_v40 = vld [vmem:[%s1484_s29 + $0x8] sm:$0xff]  ;;  %v248_v41 = vld [vmem:[%s1484_s29] sm:$0xff]  ;;  %v298_v45 = vld [vmem:[%s1870_s2 + $0x10] sm:$0xff] }
  0x35   : > { %404 = vmatprep.subr.mxu0 %v267_v14  ;;  %v296_v42 = vld [vmem:[%s1870_s2] sm:$0xff]  ;;  %v297_v44 = vld [vmem:[%s1870_s2 + $0x8] sm:$0xff]  ;;  %v299_v47 = vld [vmem:[%s1870_s2 + $0x18] sm:$0xff] }
  0x36   : > { %405 = vmatpush1.msra.mxu0 %v266_v15  ;;  %369 = vperm.xlu0 %1271, %v307_v30   ;;  %v280_v43 = vld [vmem:[%s1869_s1] sm:$0xff]  ;;  %v281_v46 = vld [vmem:[%s1869_s1 + $0x8] sm:$0xff]  ;;  %v282_v49 = vld [vmem:[%s1869_s1 + $0x10] sm:$0xff] }
  0x37   : > { %406 = vmatprep.subr.mxu0 %v265_v16  ;;  %364 = vperm.xlu1 %1272, %v306_v32   ;;  %v300_v48 = vld [vmem:[%s1870_s2 + $0x20] sm:$0xff]  ;;  %v301_v50 = vld [vmem:[%s1870_s2 + $0x28] sm:$0xff]  ;;  %v302_v51 = vld [vmem:[%s1870_s2 + $0x30] sm:$0xff] }
  0x38   : > { %407 = vmatpush1.msra.mxu0 %v264_v17  ;;  %v283_v52 = vld [vmem:[%s1869_s1 + $0x18] sm:$0xff]  ;;  %v284_v54 = vld [vmem:[%s1869_s1 + $0x20] sm:$0xff]  ;;  %v285_v55 = vld [vmem:[%s1869_s1 + $0x28] sm:$0xff] }
  0x39   : > { %408 = vmatprep.subr.mxu0 %v263_v18  ;;  %v303_v53 = vld [vmem:[%s1870_s2 + $0x38] sm:$0xff]  ;;  %v286_v56 = vld [vmem:[%s1869_s1 + $0x30] sm:$0xff]  ;;  %v288_v58 = vld [vmem:[%s1869_s1 + $0x40] sm:$0xff] }
  0x3a   : > { %409 = vmatpush1.msra.mxu0 %v262_v19  ;;  %359 = vperm.xlu0 %1271, %v305_v36   ;;  %v287_v57 = vld [vmem:[%s1869_s1 + $0x38] sm:$0xff]  ;;  %v289_v59 = vld [vmem:[%s1869_s1 + $0x48] sm:$0xff]  ;;  %v290_v60 = vld [vmem:[%s1869_s1 + $0x50] sm:$0xff] }
  0x3b   : > { %410 = vmatprep.subr.mxu0 %v261_v21  ;;  %354 = vperm.xlu1 %1272, %v304_v38   ;;  %v291_v61 = vld [vmem:[%s1869_s1 + $0x58] sm:$0xff]  ;;  %v292_v62 = vld [vmem:[%s1869_s1 + $0x60] sm:$0xff]  ;;  %v293_v63 = vld [vmem:[%s1869_s1 + $0x68] sm:$0xff] }
  0x3c   : > { %411 = vmatpush1.msra.mxu0 %v260_v23  ;;  %v294_v1 = vld [vmem:[%s1869_s1 + $0x70] sm:$0xff]  ;;  %v295_v2 = vld [vmem:[%s1869_s1 + $0x78] sm:$0xff] }
  0x3d   : > { %412 = vmatprep.subr.mxu0 %v259_v25 }
  0x3e   : > { %413 = vmatpush1.msra.mxu0 %v258_v27  ;;  %314 = vperm.xlu0 %1271, %v296_v42  }
  0x3f   : > { %414 = vmatprep.subr.mxu0 %v257_v28  ;;  %319 = vperm.xlu1 %1272, %v297_v44  }
  0x40   : > { %415 = vmatpush1.msra.mxu0 %v256_v29 }
  0x41   : > { %416 = vmatprep.subr.mxu0 %v255_v31 }
  0x42   : > { %417 = vmatpush1.msra.mxu0 %v254_v33  ;;  %324 = vperm.xlu0 %1271, %v298_v45  }
  0x43   : > { %418 = vmatprep.subr.mxu0 %v253_v34  ;;  %329 = vperm.xlu1 %1272, %v299_v47  }
  0x44   : > { %419 = vmatpush1.msra.mxu0 %v252_v35 }
  0x45   : > { %420 = vmatprep.subr.mxu0 %v251_v37 }
  0x46   : > { %421 = vmatpush1.msra.mxu0 %v250_v39  ;;  %334 = vperm.xlu0 %1271, %v300_v48  }
  0x47   : > { %422 = vmatprep.subr.mxu0 %v249_v40  ;;  %339 = vperm.xlu1 %1272, %v301_v50  }
  0x48   : > { %423 = vmatpush1.msra.mxu0 %v248_v41 }
  0x49   : > { %457 = vmatmul.mubr.f32.vlgmr.msra.gmra.mxu0 %v280_v43 }
  0x4a   : > { %462 = vmatprep.mubr.f32.mxu0 %v1388_v0  ;;  %344 = vperm.xlu0 %1271, %v302_v51  }
  0x4b   : > { %349 = vperm.xlu1 %1272, %v303_v53  }
  0x4d   : > { %463 = vmatmul.mubr.f32.gmra.mxu0 %v281_v46 }
  0x4e   : > { %468 = vmatprep.mubr.f32.mxu0 %v1388_v0 }
  0x51   : > { %469 = vmatmul.mubr.f32.gmra.mxu0 %v282_v49 }
  0x52   : > { %474 = vmatprep.mubr.f32.mxu0 %v1388_v0 }
  0x55   : > { %475 = vmatmul.mubr.f32.gmra.mxu0 %v283_v52 }
  0x56   : > { %480 = vmatprep.mubr.f32.mxu0 %v1388_v0 }
  0x59   : > { %481 = vmatmul.mubr.f32.gmra.mxu0 %v284_v54 }
  0x5a   : > { %486 = vmatprep.mubr.f32.mxu0 %v1388_v0 }
  0x5d   : > { %487 = vmatmul.mubr.f32.gmra.mxu0 %v285_v55 }
  0x5e   : > { %492 = vmatprep.mubr.f32.mxu0 %v1388_v0 }
  0x61   : > { %493 = vmatmul.mubr.f32.gmra.mxu0 %v286_v56 }
  0x62   : > { %498 = vmatprep.mubr.f32.mxu0 %v1388_v0 }
  0x65   : > { %499 = vmatmul.mubr.f32.gmra.mxu0 %v287_v57 }
  0x66   : > { %504 = vmatprep.mubr.f32.mxu0 %v1388_v0 }
  0x69   : > { %505 = vmatmul.mubr.f32.gmra.mxu0 %v288_v58 }
  0x6a   : > { %510 = vmatprep.mubr.f32.mxu0 %v1388_v0 }
  0x6d   : > { %511 = vmatmul.mubr.f32.gmra.mxu0 %v289_v59 }
  0x6e   : > { %516 = vmatprep.mubr.f32.mxu0 %v1388_v0 }
  0x71   : > { %517 = vmatmul.mubr.f32.gmra.mxu0 %v290_v60 }
  0x72   : > { %522 = vmatprep.mubr.f32.mxu0 %v1388_v0 }
  0x75   : > { %523 = vmatmul.mubr.f32.gmra.mxu0 %v291_v61 }
  0x76   : > { %528 = vmatprep.mubr.f32.mxu0 %v1388_v0 }
  0x79   : > { %529 = vmatmul.mubr.f32.gmra.mxu0 %v292_v62 }
  0x7a   : > { %534 = vmatprep.mubr.f32.mxu0 %v1388_v0 }
  0x7d   : > { %535 = vmatmul.mubr.f32.gmra.mxu0 %v293_v63 }
  0x7e   : > { %540 = vmatprep.mubr.f32.mxu0 %v1388_v0 }
  0x81   : > { %541 = vmatmul.mubr.f32.gmra.mxu0 %v294_v1 }
  0x82   : > { %546 = vmatprep.mubr.f32.mxu0 %v1388_v0 }
  0x85   : > { %547 = vmatmul.mubr.f32.gmra.mxu0 %v295_v2 }
  0xa9   : > { %v390_v3 = vpop.permute.xlu0 %389 }
  0xaa   : > { %v380_v43 = vpop.permute.xlu1 %379 }
  0xad   : > { %v385_v4 = vpop.permute.xlu0 %384 }
  0xae   : > { %v375_v46 = vpop.permute.xlu1 %374 }
  0xb1   : > { %v1634_v5 = vpop.permute.xlu0 %369 }
  0xb2   : > { %v365_v51 = vpop.permute.xlu1 %364 }
  0xb5   : > { %v1636_v6 = vpop.permute.xlu0 %359 }
  0xb6   : > { %v355_v56 = vpop.permute.xlu1 %354 }
  0xb9   : > { %v1656_v8 = vpop.permute.xlu0 %314 }
  0xba   : > { %v320_v61 = vpop.permute.xlu1 %319 }
  0xbd   : > { %v325_v1 = vpop.permute.xlu0 %324 }
 0x109   : > { %v1654_v7 = vpop.f32.mrf.mxu0 }
 0x10a   : > { %v459_v60 = vadd.f32 %v1654_v7, %v1656_v8  ;;  %v335_v7 = vpop.permute.xlu0 %334 }
 0x10b   : > { %v460_v9 = vpop.f32.mrf.mxu0 }
 0x10c   : > { %v461_v10 = vadd.f32 %v460_v9, %v1656_v8 }
 0x10d   : > { %v1659_v11 = vpop.f32.mrf.mxu0 }
 0x10e   : > { %625 = vmatprep.mubr.f32.mxu1 %v461_v10  ;;  %v465_v63 = vadd.f32 %v1659_v11, %v320_v61 }
 0x10f   : > { %v1661_v12 = vpop.f32.mrf.mxu0 }
 0x110   : > { %v467_v62 = vadd.f32 %v1661_v12, %v320_v61 }
 0x111   : > { %v1663_v13 = vpop.f32.mrf.mxu0 }
 0x113   : > { %v1665_v14 = vpop.f32.mrf.mxu0 }
 0x114   : > { %v473_v2 = vadd.f32 %v1665_v14, %v325_v1 }
 0x115   : > { %v1667_v15 = vpop.f32.mrf.mxu0 }
 0x117   : > { %v1669_v16 = vpop.f32.mrf.mxu0 }
 0x119   : > { %v1671_v0 = vpop.f32.mrf.mxu0 }
 0x11a   : > { %v483_v9 = vadd.f32 %v1671_v0, %v335_v7 }
 0x11b   : > { %v1673_v17 = vpop.f32.mrf.mxu0 }
 0x11c   : > { %v485_v8 = vadd.f32 %v1673_v17, %v335_v7 }
 0x11d   : > { %v1675_v18 = vpop.f32.mrf.mxu0 }
 0x11f   : > { %v1677_v19 = vpop.f32.mrf.mxu0 }
 0x121   : > { %v1679_v20 = vpop.f32.mrf.mxu0 }
 0x123   : > { %v1681_v21 = vpop.f32.mrf.mxu0 }
 0x125   : > { %v1683_v22 = vpop.f32.mrf.mxu0 }
 0x127   : > { %v1685_v23 = vpop.f32.mrf.mxu0 }
 0x129   : > { %v506_v24 = vpop.f32.mrf.mxu0 }
 0x12a   : > { %v507_v59 = vadd.f32 %v506_v24, %v355_v56 }
 0x12b   : > { %v508_v25 = vpop.f32.mrf.mxu0 }
 0x12c   : > { %v509_v58 = vadd.f32 %v508_v25, %v355_v56 }
 0x12d   : > { %v512_v26 = vpop.f32.mrf.mxu0 }
 0x12e   : > { %v513_v57 = vadd.f32 %v512_v26, %v1636_v6 }
 0x12f   : > { %v514_v27 = vpop.f32.mrf.mxu0 }
 0x130   : > { %v515_v55 = vadd.f32 %v514_v27, %v1636_v6 }
 0x131   : > { %v518_v28 = vpop.f32.mrf.mxu0 }
 0x132   : > { %v519_v54 = vadd.f32 %v518_v28, %v365_v51 }
 0x133   : > { %v520_v29 = vpop.f32.mrf.mxu0 }
 0x134   : > { %v521_v53 = vadd.f32 %v520_v29, %v365_v51  ;;  %v555_v29 = vld [vmem:[#allocation2 + $0x10] sm:$0xff] }
 0x135   : > { %v524_v30 = vpop.f32.mrf.mxu0 }
 0x136   : > { %v525_v52 = vadd.f32 %v524_v30, %v1634_v5 }
 0x137   : > { %v526_v31 = vpop.f32.mrf.mxu0 }
 0x138   : > { %v527_v50 = vadd.f32 %v526_v31, %v1634_v5  ;;  %v556_v31 = vld [vmem:[#allocation2 + $0x18] sm:$0xff] }
 0x139   : > { %v530_v32 = vpop.f32.mrf.mxu0 }
 0x13a   : > { %v531_v49 = vadd.f32 %v530_v32, %v375_v46 }
 0x13b   : > { %v532_v33 = vpop.f32.mrf.mxu0 }
 0x13c   : > { %v533_v48 = vadd.f32 %v532_v33, %v375_v46  ;;  %v560_v46 = vld [vmem:[#allocation2 + $0x38] sm:$0xff] }
 0x13d   : > { %v536_v34 = vpop.f32.mrf.mxu0 }
 0x13e   : > { %v537_v47 = vadd.f32 %v536_v34, %v380_v43  ;;  %v557_v34 = vld [vmem:[#allocation2 + $0x20] sm:$0xff] }
 0x13f   : > { %v538_v35 = vpop.f32.mrf.mxu0 }
 0x140   : > { %v539_v45 = vadd.f32 %v538_v35, %v380_v43 }
 0x141   : > { %v542_v36 = vpop.f32.mrf.mxu0 }
 0x142   : > { %v543_v44 = vadd.f32 %v542_v36, %v385_v4 }
 0x143   : > { %v544_v37 = vpop.f32.mrf.mxu0 }
 0x144   : > { %v545_v42 = vadd.f32 %v544_v37, %v385_v4  ;;  %v330_v4 = vpop.permute.xlu1 %329 }
 0x145   : > { %v548_v38 = vpop.f32.mrf.mxu0  ;;  %v479_v5 = vadd.f32 %v1669_v16, %v330_v4  ;;  %v477_v6 = vadd.f32 %v1667_v15, %v330_v4 }
 0x146   : > { %v549_v41 = vadd.f32 %v548_v38, %v390_v3  ;;  %v558_v38 = vld [vmem:[#allocation2 + $0x28] sm:$0xff] }
 0x147   : > { %v550_v39 = vpop.f32.mrf.mxu0 }
 0x148   : > { %v551_v40 = vadd.f32 %v550_v39, %v390_v3  ;;  %v471_v3 = vadd.f32 %v1663_v13, %v325_v1  ;;  %v340_v10 = vpop.permute.xlu1 %339  ;;  %v345_v13 = vpop.permute.xlu0 %344 }
 0x149   : > { %v491_v11 = vadd.f32 %v1677_v19, %v340_v10  ;;  %v489_v12 = vadd.f32 %v1675_v18, %v340_v10  ;;  %v497_v14 = vadd.f32 %v1681_v21, %v345_v13  ;;  %v495_v15 = vadd.f32 %v1679_v20, %v345_v13  ;;  %v553_v19 = vld [vmem:[#allocation2] sm:$0xff]  ;;  %v554_v18 = vld [vmem:[#allocation2 + $0x8] sm:$0xff] }
 0x14a   : > { %577 = vmatprep.subr.mxu1 %v551_v40 }
 0x14b   : > { %578 = vmatpush1.xpose.msra.mxu1 %v549_v41 }
 0x14c   : > { %579 = vmatprep.subr.mxu1 %v545_v42  ;;  %v350_v16 = vpop.permute.xlu1 %349  ;;  %v559_v42 = vld [vmem:[#allocation2 + $0x30] sm:$0xff] }
 0x14d   : > { %v503_v17 = vadd.f32 %v1685_v23, %v350_v16  ;;  %v501_v0 = vadd.f32 %v1683_v22, %v350_v16 }
 0x14f   : > { %580 = vmatpush1.xpose.msra.mxu1 %v543_v44 }
 0x150   : > { %581 = vmatprep.subr.mxu1 %v539_v45 }
 0x153   : > { %582 = vmatpush1.xpose.msra.mxu1 %v537_v47 }
 0x154   : > { %583 = vmatprep.subr.mxu1 %v533_v48 }
 0x157   : > { %584 = vmatpush1.xpose.msra.mxu1 %v531_v49 }
 0x158   : > { %585 = vmatprep.subr.mxu1 %v527_v50 }
 0x15b   : > { %586 = vmatpush1.xpose.msra.mxu1 %v525_v52 }
 0x15c   : > { %587 = vmatprep.subr.mxu1 %v521_v53 }
 0x15f   : > { %588 = vmatpush1.xpose.msra.mxu1 %v519_v54 }
 0x160   : > { %589 = vmatprep.subr.mxu1 %v515_v55 }
 0x163   : > { %590 = vmatpush1.xpose.msra.mxu1 %v513_v57 }
 0x164   : > { %591 = vmatprep.subr.mxu1 %v509_v58 }
 0x167   : > { %592 = vmatpush1.xpose.msra.mxu1 %v507_v59 }
 0x16a   : > { %626 = vmatmul.mubr.f32.vlgmr.msra.gmra.mxu1 %v459_v60 }
 0x16b   : > { %630 = vmatprep.mubr.f32.mxu1 %v467_v62 }
 0x16e   : > { %631 = vmatmul.mubr.f32.gmra.mxu1 %v465_v63 }
 0x16f   : > { %635 = vmatprep.mubr.f32.mxu1 %v473_v2 }
 0x172   : > { %636 = vmatmul.mubr.f32.gmra.mxu1 %v471_v3 }
 0x173   : > { %640 = vmatprep.mubr.f32.mxu1 %v479_v5 }
 0x176   : > { %641 = vmatmul.mubr.f32.gmra.mxu1 %v477_v6 }
 0x177   : > { %645 = vmatprep.mubr.f32.mxu1 %v485_v8 }
 0x17a   : > { %646 = vmatmul.mubr.f32.gmra.mxu1 %v483_v9 }
 0x17b   : > { %650 = vmatprep.mubr.f32.mxu1 %v491_v11 }
 0x17e   : > { %651 = vmatmul.mubr.f32.gmra.mxu1 %v489_v12 }
 0x17f   : > { %655 = vmatprep.mubr.f32.mxu1 %v497_v14 }
 0x182   : > { %656 = vmatmul.mubr.f32.gmra.mxu1 %v495_v15 }
 0x183   : > { %660 = vmatprep.mubr.f32.mxu1 %v503_v17 }
 0x186   : > { %661 = vmatmul.mubr.f32.gmra.mxu1 %v501_v0 }
 0x22a   : > { %v627_v24 = vpop.f32.mrf.mxu1 }
 0x22b   : > { %v666_v25 = vadd.f32 %v627_v24, %v553_v19 }
 0x22c   : > { %v629_v26 = vpop.f32.mrf.mxu1 }
 0x22d   : > { %675 = vst.msk [vmem:[#allocation2] sm:$0xff] %vm239_vm0, %v666_v25 }
 0x22e   : > { %v632_v21 = vpop.f32.mrf.mxu1 }
 0x22f   : > { %v667_v27 = vadd.f32 %v632_v21, %v554_v18 }
 0x230   : > { %v634_v28 = vpop.f32.mrf.mxu1 }
 0x231   : > { %676 = vst.msk [vmem:[#allocation2 + $0x8] sm:$0xff] %vm239_vm0, %v667_v27 }
 0x232   : > { %v637_v20 = vpop.f32.mrf.mxu1 }
 0x233   : > { %v668_v23 = vadd.f32 %v637_v20, %v555_v29 }
 0x234   : > { %v639_v30 = vpop.f32.mrf.mxu1  ;;  %v686_v1 = vld [vmem:[#allocation2] sm:$0xff] }
 0x235   : > { %677 = vst.msk [vmem:[#allocation2 + $0x10] sm:$0xff] %vm239_vm0, %v668_v23  ;;  %v694_v2 = vsel %vm239_vm0, %v686_v1, -inf }
 0x236   : > { %v642_v22 = vpop.f32.mrf.mxu1 }
 0x237   : > { %v669_v32 = vadd.f32 %v642_v22, %v556_v31 }
 0x238   : > { %v644_v33 = vpop.f32.mrf.mxu1  ;;  %v687_v57 = vld [vmem:[#allocation2 + $0x8] sm:$0xff] }
 0x239   : > { %678 = vst.msk [vmem:[#allocation2 + $0x18] sm:$0xff] %vm239_vm0, %v669_v32  ;;  %v697_v59 = vsel %vm239_vm0, %v687_v57, -inf }
 0x23a   : > { %v647_v35 = vpop.f32.mrf.mxu1 }
 0x23b   : > { %v670_v36 = vadd.f32 %v647_v35, %v557_v34 }
 0x23c   : > { %v649_v37 = vpop.f32.mrf.mxu1  ;;  %v688_v62 = vld [vmem:[#allocation2 + $0x10] sm:$0xff] }
 0x23d   : > { %679 = vst.msk [vmem:[#allocation2 + $0x20] sm:$0xff] %vm239_vm0, %v670_v36  ;;  %v700_v63 = vsel %vm239_vm0, %v688_v62, -inf }
 0x23e   : > { %v652_v39 = vpop.f32.mrf.mxu1 }
 0x23f   : > { %v671_v40 = vadd.f32 %v652_v39, %v558_v38 }
 0x240   : > { %v654_v41 = vpop.f32.mrf.mxu1  ;;  %v689_v52 = vld [vmem:[#allocation2 + $0x18] sm:$0xff] }
 0x241   : > { %680 = vst.msk [vmem:[#allocation2 + $0x28] sm:$0xff] %vm239_vm0, %v671_v40  ;;  %v703_v55 = vsel %vm239_vm0, %v689_v52, -inf }
 0x242   : > { %v657_v43 = vpop.f32.mrf.mxu1 }
 0x243   : > { %v672_v44 = vadd.f32 %v657_v43, %v559_v42  ;;  %v782_v42 = vld [vmem:[%s1871_s3] sm:$0xff] }
 0x244   : > { %v659_v45 = vpop.f32.mrf.mxu1  ;;  %v690_v60 = vld [vmem:[#allocation2 + $0x20] sm:$0xff]  ;;  %1188 = vmatprep.mubr.msk.f32.mxu1 %vm239_vm0, %v782_v42 }
 0x245   : > { %681 = vst.msk [vmem:[#allocation2 + $0x30] sm:$0xff] %vm239_vm0, %v672_v44  ;;  %v706_v61 = vsel %vm239_vm0, %v690_v60, -inf }
 0x246   : > { %v662_v47 = vpop.f32.mrf.mxu1 }
 0x247   : > { %v673_v48 = vadd.f32 %v662_v47, %v560_v46 }
 0x248   : > { %v664_v49 = vpop.f32.mrf.mxu1  ;;  %v691_v56 = vld [vmem:[#allocation2 + $0x28] sm:$0xff] }
 0x249   : > { %682 = vst.msk [vmem:[#allocation2 + $0x38] sm:$0xff] %vm239_vm0, %v673_v48  ;;  %v709_v58 = vsel %vm239_vm0, %v691_v56, -inf }
 0x24c   : > { %v692_v50 = vld [vmem:[#allocation2 + $0x30] sm:$0xff] }
 0x24d   : > { %v712_v51 = vsel %vm239_vm0, %v692_v50, -inf }
 0x24e   : > { %713 = vmax.xlane.f32.xlu1 %v712_v51 }
 0x250   : > { %v693_v53 = vld [vmem:[#allocation2 + $0x38] sm:$0xff] }
 0x251   : > { %v715_v54 = vsel %vm239_vm0, %v693_v53, -inf }
 0x252   : > { %716 = vmax.xlane.f32.xlu0 %v715_v54  ;;  %704 = vmax.xlane.f32.xlu1 %v703_v55 }
 0x256   : > { %710 = vmax.xlane.f32.xlu0 %v709_v58  ;;  %698 = vmax.xlane.f32.xlu1 %v697_v59 }
 0x25a   : > { %707 = vmax.xlane.f32.xlu0 %v706_v61 }
 0x25e   : > { %701 = vmax.xlane.f32.xlu0 %v700_v63 }
 0x262   : > { %695 = vmax.xlane.f32.xlu0 %v694_v2 }
 0x2d7   : > { %v714_v3 = vpop.xlane.xlu1 %713 }
 0x2d8   : > { %v724_v4 = vsub.f32 %v692_v50, %v714_v3 }
 0x2da   : > { %v738_v5 = vmul.f32 1.442695, %v724_v4  ;;  %v783_v4 = vld [vmem:[%s1871_s3 + $0x8] sm:$0xff] }
 0x2db   : > { %v717_v6 = vpop.xlane.xlu0 %716  ;;  %v705_v7 = vpop.xlane.xlu1 %704 }
 0x2dc   : > { %1273 = vpow2.f32 %v738_v5  ;;  %v725_v8 = vsub.f32 %v693_v53, %v717_v6  ;;  %v721_v10 = vsub.f32 %v689_v52, %v705_v7  ;;  %v784_v5 = vld [vmem:[%s1871_s3 + $0x10] sm:$0xff]  ;;  %v785_v6 = vld [vmem:[%s1871_s3 + $0x18] sm:$0xff]  ;;  %v786_v7 = vld [vmem:[%s1871_s3 + $0x20] sm:$0xff] }
 0x2de   : > { %v740_v9 = vmul.f32 1.442695, %v725_v8  ;;  %v732_v14 = vmul.f32 1.442695, %v721_v10  ;;  %v787_v8 = vld [vmem:[%s1871_s3 + $0x28] sm:$0xff]  ;;  %v789_v10 = vld [vmem:[%s1871_s3 + $0x38] sm:$0xff] }
 0x2df   : > { %v711_v11 = vpop.xlane.xlu0 %710  ;;  %v699_v12 = vpop.xlane.xlu1 %698 }
 0x2e0   : > { %1275 = vpow2.f32 %v740_v9  ;;  %v723_v13 = vsub.f32 %v691_v56, %v711_v11  ;;  %v719_v16 = vsub.f32 %v687_v57, %v699_v12  ;;  %v788_v9 = vld [vmem:[%s1871_s3 + $0x30] sm:$0xff]  ;;  %v790_v11 = vld [vmem:[%s1871_s3 + $0x40] sm:$0xff]  ;;  %v791_v12 = vld [vmem:[%s1871_s3 + $0x48] sm:$0xff] }
 0x2e2   : > { %v736_v15 = vmul.f32 1.442695, %v723_v13  ;;  %v728_v19 = vmul.f32 1.442695, %v719_v16  ;;  %v792_v13 = vld [vmem:[%s1871_s3 + $0x50] sm:$0xff]  ;;  %v795_v16 = vld [vmem:[%s1871_s3 + $0x68] sm:$0xff] }
 0x2e3   : > { %v708_v17 = vpop.xlane.xlu0 %707 }
 0x2e4   : > { %1277 = vpow2.f32 %v736_v15  ;;  %v722_v0 = vsub.f32 %v690_v60, %v708_v17  ;;  %v794_v15 = vld [vmem:[%s1871_s3 + $0x60] sm:$0xff]  ;;  %v796_v17 = vld [vmem:[%s1871_s3 + $0x70] sm:$0xff] }
 0x2e5   : > { %1279 = vpow2.f32 %v732_v14  ;;  %v793_v14 = vld [vmem:[%s1871_s3 + $0x58] sm:$0xff] }
 0x2e6   : > { %v734_v24 = vmul.f32 1.442695, %v722_v0  ;;  %v797_v0 = vld [vmem:[%s1871_s3 + $0x78] sm:$0xff] }
 0x2e7   : > { %v702_v25 = vpop.xlane.xlu0 %701 }
 0x2e8   : > { %1281 = vpow2.f32 %v734_v24  ;;  %v720_v26 = vsub.f32 %v688_v62, %v702_v25 }
 0x2e9   : > { %v1274_v18 = vpop.eup %1273  ;;  %1283 = vpow2.f32 %v728_v19 }
 0x2ea   : > { %v730_v21 = vmul.f32 1.442695, %v720_v26  ;;  %v760_v27 = vsel %vm239_vm0, %v1274_v18, 0.0 }
 0x2eb   : > { %761 = vadd.xlane.f32.xlu0 %v760_v27  ;;  %v696_v28 = vpop.xlane.xlu0 %695 }
 0x2ec   : > { %1285 = vpow2.f32 %v730_v21  ;;  %v718_v29 = vsub.f32 %v686_v1, %v696_v28 }
 0x2ed   : > { %v1276_v20 = vpop.eup %1275 }
 0x2ee   : > { %v726_v23 = vmul.f32 1.442695, %v718_v29  ;;  %v763_v30 = vsel %vm239_vm0, %v1276_v20, 0.0 }
 0x2ef   : > { %764 = vadd.xlane.f32.xlu1 %v763_v30 }
 0x2f0   : > { %1287 = vpow2.f32 %v726_v23 }
 0x2f1   : > { %v1278_v31 = vpop.eup %1277 }
 0x2f2   : > { %v757_v22 = vsel %vm239_vm0, %v1278_v31, 0.0  ;;  %v1280_v32 = vpop.eup %1279 }
 0x2f3   : > { %758 = vadd.xlane.f32.xlu1 %v757_v22  ;;  %v751_v34 = vsel %vm239_vm0, %v1280_v32, 0.0 }
 0x2f5   : > { %v1282_v33 = vpop.eup %1281 }
 0x2f6   : > { %v754_v35 = vsel %vm239_vm0, %v1282_v33, 0.0  ;;  %v1284_v36 = vpop.eup %1283 }
 0x2f7   : > { %752 = vadd.xlane.f32.xlu1 %v751_v34  ;;  %755 = vadd.xlane.f32.xlu0 %v754_v35  ;;  %v745_v38 = vsel %vm239_vm0, %v1284_v36, 0.0 }
 0x2f9   : > { %v1286_v37 = vpop.eup %1285 }
 0x2fa   : > { %v748_v39 = vsel %vm239_vm0, %v1286_v37, 0.0 }
 0x2fb   : > { %746 = vadd.xlane.f32.xlu1 %v745_v38  ;;  %749 = vadd.xlane.f32.xlu0 %v748_v39 }
 0x2fd   : > { %v1288_v40 = vpop.eup %1287 }
 0x2fe   : > { %v742_v41 = vsel %vm239_vm0, %v1288_v40, 0.0 }
 0x2ff   : > { %743 = vadd.xlane.f32.xlu0 %v742_v41 }
 0x374   : > { %v762_v43 = vpop.xlane.xlu0 %761 }
 0x375   : > { %1289 = vrcp.f32 %v762_v43 }
 0x378   : > { %v765_v44 = vpop.xlane.xlu1 %764 }
 0x379   : > { %1291 = vrcp.f32 %v765_v44 }
 0x37c   : > { %v759_v45 = vpop.xlane.xlu1 %758 }
 0x37d   : > { %1293 = vrcp.f32 %v759_v45 }
 0x380   : > { %v756_v46 = vpop.xlane.xlu0 %755  ;;  %v753_v47 = vpop.xlane.xlu1 %752 }
 0x381   : > { %1295 = vrcp.f32 %v756_v46 }
 0x382   : > { %v1290_v48 = vpop.eup %1289  ;;  %1297 = vrcp.f32 %v753_v47 }
 0x383   : > { %v780_v52 = vmul.f32 %v1290_v48, %v1274_v18 }
 0x384   : > { %v750_v50 = vpop.xlane.xlu0 %749  ;;  %v747_v54 = vpop.xlane.xlu1 %746 }
 0x385   : > { %1299 = vrcp.f32 %v750_v50 }
 0x386   : > { %v1292_v49 = vpop.eup %1291  ;;  %1301 = vrcp.f32 %v747_v54 }
 0x387   : > { %v781_v51 = vmul.f32 %v1292_v49, %v1276_v20 }
 0x388   : > { %v744_v56 = vpop.xlane.xlu0 %743 }
 0x389   : > { %1172 = vmatprep.subr.msk.mxu1 %vm239_vm0, %v781_v51  ;;  %1303 = vrcp.f32 %v744_v56 }
 0x38a   : > { %v1294_v53 = vpop.eup %1293  ;;  %1173 = vmatpush3.xpose.msk.msra.mxu1 %vm239_vm0, %v781_v51 }
 0x38b   : > { %1174 = vmatprep.subr.msk.mxu1 %vm239_vm0, %v780_v52  ;;  %v779_v55 = vmul.f32 %v1294_v53, %v1278_v31 }
 0x38e   : > { %1175 = vmatpush3.xpose.msk.msra.mxu1 %vm239_vm0, %v780_v52  ;;  %v1296_v57 = vpop.eup %1295 }
 0x38f   : > { %1176 = vmatprep.subr.msk.mxu1 %vm239_vm0, %v779_v55  ;;  %v778_v58 = vmul.f32 %v1296_v57, %v1282_v33  ;;  %v1298_v59 = vpop.eup %1297 }
 0x390   : > { %v777_v60 = vmul.f32 %v1298_v59, %v1280_v32 }
 0x392   : > { %1177 = vmatpush3.xpose.msk.msra.mxu1 %vm239_vm0, %v779_v55  ;;  %v1300_v61 = vpop.eup %1299 }
 0x393   : > { %1178 = vmatprep.subr.msk.mxu1 %vm239_vm0, %v778_v58  ;;  %v776_v62 = vmul.f32 %v1300_v61, %v1286_v37  ;;  %v1302_v63 = vpop.eup %1301 }
 0x394   : > { %v775_v1 = vmul.f32 %v1302_v63, %v1284_v36 }
 0x396   : > { %1179 = vmatpush3.xpose.msk.msra.mxu1 %vm239_vm0, %v778_v58  ;;  %v1304_v2 = vpop.eup %1303 }
 0x397   : > { %1180 = vmatprep.subr.msk.mxu1 %vm239_vm0, %v777_v60  ;;  %v774_v3 = vmul.f32 %v1304_v2, %v1288_v40 }
 0x39a   : > { %1181 = vmatpush3.xpose.msk.msra.mxu1 %vm239_vm0, %v777_v60 }
 0x39b   : > { %1182 = vmatprep.subr.msk.mxu1 %vm239_vm0, %v776_v62 }
 0x39e   : > { %1183 = vmatpush3.xpose.msk.msra.mxu1 %vm239_vm0, %v776_v62 }
 0x39f   : > { %1184 = vmatprep.subr.msk.mxu1 %vm239_vm0, %v775_v1 }
 0x3a2   : > { %1185 = vmatpush3.xpose.msk.msra.mxu1 %vm239_vm0, %v775_v1 }
 0x3a3   : > { %1186 = vmatprep.subr.msk.mxu1 %vm239_vm0, %v774_v3 }
 0x3a6   : > { %1187 = vmatpush3.xpose.msk.msra.mxu1 %vm239_vm0, %v774_v3 }
 0x3a9   : > { %1189 = vmatmul.mubr.msk.f32.vlgmr.msra.gmra.mxu1 %vm239_vm0, %v783_v4 }
 0x3aa   : > { %1191 = vmatprep.mubr.msk.f32.mxu1 %vm239_vm0, %v784_v5 }
 0x3ad   : > { %1192 = vmatmul.mubr.msk.f32.gmra.mxu1 %vm239_vm0, %v785_v6 }
 0x3ae   : > { %1194 = vmatprep.mubr.msk.f32.mxu1 %vm239_vm0, %v786_v7 }
 0x3b1   : > { %1195 = vmatmul.mubr.msk.f32.gmra.mxu1 %vm239_vm0, %v787_v8 }
 0x3b2   : > { %1197 = vmatprep.mubr.msk.f32.mxu1 %vm239_vm0, %v788_v9 }
 0x3b5   : > { %1198 = vmatmul.mubr.msk.f32.gmra.mxu1 %vm239_vm0, %v789_v10 }
 0x3b6   : > { %1200 = vmatprep.mubr.msk.f32.mxu1 %vm239_vm0, %v790_v11 }
 0x3b9   : > { %1201 = vmatmul.mubr.msk.f32.gmra.mxu1 %vm239_vm0, %v791_v12 }
 0x3ba   : > { %1203 = vmatprep.mubr.msk.f32.mxu1 %vm239_vm0, %v792_v13 }
 0x3bd   : > { %1204 = vmatmul.mubr.msk.f32.gmra.mxu1 %vm239_vm0, %v793_v14 }
 0x3be   : > { %1206 = vmatprep.mubr.msk.f32.mxu1 %vm239_vm0, %v794_v15 }
 0x3c1   : > { %1207 = vmatmul.mubr.msk.f32.gmra.mxu1 %vm239_vm0, %v795_v16 }
 0x3c2   : > { %1209 = vmatprep.mubr.msk.f32.mxu1 %vm239_vm0, %v796_v17 }
 0x3c5   : > { %1210 = vmatmul.mubr.msk.f32.gmra.mxu1 %vm239_vm0, %v797_v0 }
 0x469   : > { %v1190_v19 = vpop.f32.mrf.mxu1 }
 0x46a   : > { %1016 = vst.msk [vmem:[%s1816_s7 + $0x8] sm:$0xff] %vm239_vm0, %v1190_v19 }
 0x46b   : > { %v936_v24 = vpop.f32.mrf.mxu1 }
 0x46c   : > { %1015 = vst.msk [vmem:[%s1816_s7] sm:$0xff] %vm239_vm0, %v936_v24 }
 0x46d   : > { %v1193_v25 = vpop.f32.mrf.mxu1 }
 0x46e   : > { %1018 = vst.msk [vmem:[%s1816_s7 + $0x18] sm:$0xff] %vm239_vm0, %v1193_v25 }
 0x46f   : > { %v946_v26 = vpop.f32.mrf.mxu1 }
 0x470   : > { %1017 = vst.msk [vmem:[%s1816_s7 + $0x10] sm:$0xff] %vm239_vm0, %v946_v26 }
 0x471   : > { %v1196_v18 = vpop.f32.mrf.mxu1 }
 0x472   : > { %1020 = vst.msk [vmem:[%s1816_s7 + $0x28] sm:$0xff] %vm239_vm0, %v1196_v18 }
 0x473   : > { %v956_v21 = vpop.f32.mrf.mxu1 }
 0x474   : > { %1019 = vst.msk [vmem:[%s1816_s7 + $0x20] sm:$0xff] %vm239_vm0, %v956_v21 }
 0x475   : > { %v1199_v27 = vpop.f32.mrf.mxu1 }
 0x476   : > { %1022 = vst.msk [vmem:[%s1816_s7 + $0x38] sm:$0xff] %vm239_vm0, %v1199_v27 }
 0x477   : > { %v966_v28 = vpop.f32.mrf.mxu1 }
 0x478   : > { %1021 = vst.msk [vmem:[%s1816_s7 + $0x30] sm:$0xff] %vm239_vm0, %v966_v28 }
 0x479   : > { %v1202_v29 = vpop.f32.mrf.mxu1 }
 0x47a   : > { %1024 = vst.msk [vmem:[%s1816_s7 + $0x48] sm:$0xff] %vm239_vm0, %v1202_v29 }
 0x47b   : > { %v976_v20 = vpop.f32.mrf.mxu1 }
 0x47c   : > { %1023 = vst.msk [vmem:[%s1816_s7 + $0x40] sm:$0xff] %vm239_vm0, %v976_v20 }
 0x47d   : > { %v1205_v23 = vpop.f32.mrf.mxu1 }
 0x47e   : > { %1026 = vst.msk [vmem:[%s1816_s7 + $0x58] sm:$0xff] %vm239_vm0, %v1205_v23 }
 0x47f   : > { %v986_v30 = vpop.f32.mrf.mxu1 }
 0x480   : > { %1025 = vst.msk [vmem:[%s1816_s7 + $0x50] sm:$0xff] %vm239_vm0, %v986_v30 }
 0x481   : > { %v1208_v31 = vpop.f32.mrf.mxu1 }
 0x482   : > { %1028 = vst.msk [vmem:[%s1816_s7 + $0x68] sm:$0xff] %vm239_vm0, %v1208_v31 }
 0x483   : > { %v996_v22 = vpop.f32.mrf.mxu1 }
 0x484   : > { %1027 = vst.msk [vmem:[%s1816_s7 + $0x60] sm:$0xff] %vm239_vm0, %v996_v22 }
 0x485   : > { %v1211_v32 = vpop.f32.mrf.mxu1 }
 0x486   : > { %1030 = vst.msk [vmem:[%s1816_s7 + $0x78] sm:$0xff] %vm239_vm0, %v1211_v32 }
 0x487   : > { %v1006_v33 = vpop.f32.mrf.mxu1 }
 0x488   : > { %1029 = vst.msk [vmem:[%s1816_s7 + $0x70] sm:$0xff] %vm239_vm0, %v1006_v33 }
 0x489 PF: > { %s17_s20 = sadd.s32 1, %s1383_s20   ;;  %s1876_s15 = smov %s1367_s16 }
 0x48a   : > { %p14_p8 = scmp.ge.s32.totalorder %s17_s20, 4   ;;  %s1877_s16 = smov %s1371_s17 }
 0x48b   : > { %s1878_s17 = smov %s1464_s27  ;;  %s1879_s18 = smov %s1379_s19 }
 0x48c   : > { %s1880_s19 = smov %s1882_s22  ;;  %16 = sbr.rel (!%p14_p8) target bundleno = 4 (0x4), region = 84 }
 0x491   :  { %1052 = vsyncpa [#allocation4], 1 }
 0x492   :  { %1054 = vsyncpa [#allocation4 + $0x1], 1 }

// kernel: tpu_custom_call.1
= control target key start
LH: loop header
LB: loop body
LE: loop exit
PB: predicated region body
PF: predicated region fallthrough
CT: control target
= control target key end

     0   :  { %9 = vsyncpa [#allocation4], 0  ;;  %s1868_s0 = inlined_call_operand.hbm [shape: f32[2,128,256], index: 0, kind: input, shape index: {}]   ;;  %s1869_s1 = inlined_call_operand.vmem [shape: f32[128,128], index: 1, kind: input, shape index: {}]   ;;  %s1870_s2 = inlined_call_operand.vmem [shape: f32[128,1], index: 2, kind: input, shape index: {}]   ;;  %s1871_s3 = inlined_call_operand.vmem [shape: f32[128,64], index: 3, kind: input, shape index: {}]   ;;  %s1872_s4 = inlined_call_operand.vmem [shape: f32[2,128,64], index: 4, kind: output, shape index: {}]  }
   0x1   :  { %11 = vsyncpa [#allocation4 + $0x1], 0  ;;  %s1415_s15 = smov 0   ;;  %s1417_s16 = smov 0  }
   0x2   :  { %s1419_s17 = smov 0   ;;  %s1421_s18 = smov 0  }
   0x3   :  { %s1423_s19 = smov 0   ;;  %s1425_s20 = smov 0  }
   0x4 LB: > { %s1109_s21 = sadd.s32 4294967295, %s1383_s20   ;;  %s29_s22 = sadd.s32 1, %s1379_s19  ;;  %s1383_s20 = sphi %s1425_s20, %s17_s20   ;;  %s1379_s19 = sphi %s1423_s19, %s1880_s19   ;;  %s1375_s18 = sphi %s1421_s18, %s1879_s18   ;;  %s1371_s17 = sphi %s1419_s17, %s1878_s17   ;;  %s1367_s16 = sphi %s1417_s16, %s1877_s16   ;;  %s1363_s15 = sphi %s1415_s15, %s1876_s15  }
   0x5   : > { %p31_p0 = scmp.ge.s32.totalorder %s29_s22, 2  ;;  %s38_s23 = sadd.s32 1, %s1371_s17 }
   0x6   : > { %p45_p1 = scmp.ne.s32.totalorder %s1371_s17, %s1367_s16  ;;  %p46_p2 = scmp.eq.s32.totalorder %s1383_s20, 0 }
   0x7   : > { %s1882_s22 = smov (%p31_p0, %s29_s22), 0  ;;  %p51_p4 = scmp.ne.s32.totalorder %s1367_s16, %s1363_s15 }
   0x8   : > { %p1451_p3 = por %p46_p2, %p45_p1  ;;  %s33_s25 = ssub.s32 %s1379_s19, %s1882_s22 }
   0x9   : > { %p52_p5 = scmp.eq.s32.totalorder %s1109_s21, 0  ;;  %p36_p6 = scmp.eq.s32.totalorder %s33_s25, 0 }
   0xa   : > { %p1218_p8 = scmp.lt.s32.totalorder %s1383_s20, 2  ;;  %s173_s28 = sand.u32 1, %s1371_s17  }
   0xb   : > { %p1458_p7 = por %p52_p5, %p51_p4  ;;  %s1146_s29 = sshll.u32 %s1379_s19, 12 }
   0xc   : > { %s1464_s27 = scalar_select %p36_p6, %s1371_s17, %s38_s23  }
   0xd   : > { %s1113_s30 = sshll.u32 %s173_s28, 8  ;;  %s185_s7 = scalar_lea.hbm %s1868_s0, %s1146_s29 }
   0xe   : > { %s177_s8 = scalar_lea.vmem [#allocation3], %s1113_s30  ;;  %p1473_p9 = pnand %p1218_p8, %p1451_p3 }
   0xf   : > { %s186_s9 = sshll.u32 %s177_s8, 4  ;;  %s174_s11 = scalar_lea.sflag [#allocation4], %s173_s28  ;;  %s187_s9 = int_to_ptr.vmem [resolvable:$true] %s186_s9 }
  0x10   : > { %p1307_p10 = pneg %p1473_p9  ;;  %s1318_s12 = scalar_lea.vmem %s187_s9, 4096 }
  0x11   : > { %p1319_p11 = scmp.ne.s32.totalorder %s187_s9, %s1318_s12  ;;  %s1385_s13 = smov [#allocation3]  }
  0x12   : > { %s1323_s14 = sshll.u32 %s1385_s13, 4  ;;  %s1324_s14 = int_to_ptr.vmem [resolvable:$false] %s1323_s14 }
  0x13   : > { %p1321_p12 = pnand %p1319_p11, %p1307_p10  ;;  %s1325_s15 = scalar_lea.vmem %s1324_s14, 8192 }
  0x14   : > { %p1326_p0 = scmp.lt.s32.totalorder %s187_s9, %s1324_s14  ;;  %p1327_p1 = scmp.lt.s32.totalorder %s1325_s15, %s1318_s12 }
  0x15   : > { %p1322_p13 = pneg %p1321_p12 }
  0x16   : > { %p1328_p2 = por %p1327_p1, %p1326_p0 }
  0x18   : > { %p1329_p3 = pnand %p1328_p2, %p1322_p13 }
  0x1a   : > { %1332 = shalt.err (!%p1329_p3)
}
  0x1b   : > { %s1386_s21 = smov 256   ;;  %s1387_s23 = smov 16  }
  0x1c   : > { %1217 = dma.hbm_to_vmem [thread:$0]  (!%p1473_p9), %s185_s7, 4096, %s187_s9, %s174_s11, %s1386_s21, %s1386_s21, %s1387_s23  }
  0x1d   : > { %p1116_p4 = scmp.ge.s32.totalorder %s1383_s20, 1  ;;  %p194_p5 = scmp.lt.s32.totalorder %s1383_s20, 3 }
  0x1f   : > { %p195_p6 = pnand %p1116_p4, %p194_p5 }
  0x20   : > { %s200_s24 = sand.u32 (!%p195_p6), 1, %s1367_s16  }
  0x21   : > { %198 = sbr.rel (%p195_p6) target bundleno = 1161 (0x489), region = 36  ;;  %s1117_s25 = sshll.u32 (!%p195_p6), %s200_s24, 8 }
  0x22   : > { %s201_s28 = scalar_lea.sflag (!%p195_p6), [#allocation4], %s200_s24  ;;  %s1484_s29 = scalar_lea.vmem (!%p195_p6), [#allocation3], %s1117_s25 }
  0x26   : > { %1358 = dma.done.wait (%p1458_p7), %s201_s28, 4096  }
  0x27   : > { %1360 = vsyncadd (%p1458_p7), %s201_s28, 4294963200  ;;  %v1388_v0 = vmov 0.0   ;;  %v1389_v1 = vmov 0   ;;  %v279_v2 = vld [vmem:[%s1484_s29 + $0xf8] sm:$0xff]  ;;  %v278_v3 = vld [vmem:[%s1484_s29 + $0xf0] sm:$0xff]  ;;  %vm239_vm0 = vcmask 523264  }
  0x28   : > { %456 = vmatprep.mubr.f32.mxu0 %v1388_v0  ;;  %1271 = vset.pattern.permute.xlu0 %v1389_v1  ;;  %v277_v4 = vld [vmem:[%s1484_s29 + $0xe8] sm:$0xff]  ;;  %v276_v5 = vld [vmem:[%s1484_s29 + $0xe0] sm:$0xff]  ;;  %v275_v6 = vld [vmem:[%s1484_s29 + $0xd8] sm:$0xff]  ;;  %240 = vst.msk [vmem:[#allocation2] sm:$0xff] %vm239_vm0, %v1388_v0  ;;  %p230_p7 = scmp.lt.s32.totalorder %s1375_s18, 1 }
  0x29   : > { %1272 = vset.pattern.permute.xlu1 %v1389_v1  ;;  %392 = vmatprep.subr.mxu0 %v279_v2  ;;  %v274_v7 = vld [vmem:[%s1484_s29 + $0xd0] sm:$0xff]  ;;  %v273_v8 = vld [vmem:[%s1484_s29 + $0xc8] sm:$0xff]  ;;  %v272_v9 = vld [vmem:[%s1484_s29 + $0xc0] sm:$0xff]  ;;  %241 = vst.msk [vmem:[#allocation2 + $0x8] sm:$0xff] %vm239_vm0, %v1388_v0 }
  0x2a   : > { %393 = vmatpush1.msra.mxu0 %v278_v3  ;;  %v271_v10 = vld [vmem:[%s1484_s29 + $0xb8] sm:$0xff]  ;;  %v270_v11 = vld [vmem:[%s1484_s29 + $0xb0] sm:$0xff]  ;;  %v269_v12 = vld [vmem:[%s1484_s29 + $0xa8] sm:$0xff]  ;;  %242 = vst.msk [vmem:[#allocation2 + $0x10] sm:$0xff] %vm239_vm0, %v1388_v0  ;;  %s1884_s18 = smov (!%p230_p7, %s1375_s18), 1 }
  0x2b   : > { %394 = vmatprep.subr.mxu0 %v277_v4  ;;  %v268_v13 = vld [vmem:[%s1484_s29 + $0xa0] sm:$0xff]  ;;  %v267_v14 = vld [vmem:[%s1484_s29 + $0x98] sm:$0xff]  ;;  %v266_v15 = vld [vmem:[%s1484_s29 + $0x90] sm:$0xff]  ;;  %243 = vst.msk [vmem:[#allocation2 + $0x18] sm:$0xff] %vm239_vm0, %v1388_v0  ;;  %s1147_s5 = sshll.u32 %s1884_s18, 7 }
  0x2c   : > { %395 = vmatpush1.msra.mxu0 %v276_v5  ;;  %v265_v16 = vld [vmem:[%s1484_s29 + $0x88] sm:$0xff]  ;;  %v264_v17 = vld [vmem:[%s1484_s29 + $0x80] sm:$0xff]  ;;  %v263_v18 = vld [vmem:[%s1484_s29 + $0x78] sm:$0xff]  ;;  %244 = vst.msk [vmem:[#allocation2 + $0x20] sm:$0xff] %vm239_vm0, %v1388_v0  ;;  %s1816_s7 = scalar_lea.vmem %s1872_s4, %s1147_s5 }
  0x2d   : > { %396 = vmatprep.subr.mxu0 %v275_v6  ;;  %v262_v19 = vld [vmem:[%s1484_s29 + $0x70] sm:$0xff]  ;;  %v311_v20 = vld [vmem:[%s1870_s2 + $0x78] sm:$0xff]  ;;  %v261_v21 = vld [vmem:[%s1484_s29 + $0x68] sm:$0xff]  ;;  %245 = vst.msk [vmem:[#allocation2 + $0x28] sm:$0xff] %vm239_vm0, %v1388_v0 }
  0x2e   : > { %397 = vmatpush1.msra.mxu0 %v274_v7  ;;  %389 = vperm.xlu0 %1271, %v311_v20   ;;  %v309_v22 = vld [vmem:[%s1870_s2 + $0x68] sm:$0xff]  ;;  %v260_v23 = vld [vmem:[%s1484_s29 + $0x60] sm:$0xff]  ;;  %v310_v24 = vld [vmem:[%s1870_s2 + $0x70] sm:$0xff]  ;;  %246 = vst.msk [vmem:[#allocation2 + $0x30] sm:$0xff] %vm239_vm0, %v1388_v0 }
  0x2f   : > { %398 = vmatprep.subr.mxu0 %v273_v8  ;;  %379 = vperm.xlu1 %1272, %v309_v22   ;;  %v259_v25 = vld [vmem:[%s1484_s29 + $0x58] sm:$0xff]  ;;  %v308_v26 = vld [vmem:[%s1870_s2 + $0x60] sm:$0xff]  ;;  %v258_v27 = vld [vmem:[%s1484_s29 + $0x50] sm:$0xff]  ;;  %247 = vst.msk [vmem:[#allocation2 + $0x38] sm:$0xff] %vm239_vm0, %v1388_v0 }
  0x30   : > { %399 = vmatpush1.msra.mxu0 %v272_v9  ;;  %v257_v28 = vld [vmem:[%s1484_s29 + $0x48] sm:$0xff]  ;;  %v256_v29 = vld [vmem:[%s1484_s29 + $0x40] sm:$0xff]  ;;  %v307_v30 = vld [vmem:[%s1870_s2 + $0x58] sm:$0xff] }
  0x31   : > { %400 = vmatprep.subr.mxu0 %v271_v10  ;;  %v255_v31 = vld [vmem:[%s1484_s29 + $0x38] sm:$0xff]  ;;  %v306_v32 = vld [vmem:[%s1870_s2 + $0x50] sm:$0xff]  ;;  %v253_v34 = vld [vmem:[%s1484_s29 + $0x28] sm:$0xff] }
  0x32   : > { %401 = vmatpush1.msra.mxu0 %v270_v11  ;;  %384 = vperm.xlu0 %1271, %v310_v24   ;;  %v254_v33 = vld [vmem:[%s1484_s29 + $0x30] sm:$0xff]  ;;  %v252_v35 = vld [vmem:[%s1484_s29 + $0x20] sm:$0xff]  ;;  %v305_v36 = vld [vmem:[%s1870_s2 + $0x48] sm:$0xff] }
  0x33   : > { %402 = vmatprep.subr.mxu0 %v269_v12  ;;  %374 = vperm.xlu1 %1272, %v308_v26   ;;  %v251_v37 = vld [vmem:[%s1484_s29 + $0x18] sm:$0xff]  ;;  %v304_v38 = vld [vmem:[%s1870_s2 + $0x40] sm:$0xff]  ;;  %v250_v39 = vld [vmem:[%s1484_s29 + $0x10] sm:$0xff] }
  0x34   : > { %403 = vmatpush1.msra.mxu0 %v268_v13  ;;  %v249_v40 = vld [vmem:[%s1484_s29 + $0x8] sm:$0xff]  ;;  %v248_v41 = vld [vmem:[%s1484_s29] sm:$0xff]  ;;  %v298_v45 = vld [vmem:[%s1870_s2 + $0x10] sm:$0xff] }
  0x35   : > { %404 = vmatprep.subr.mxu0 %v267_v14  ;;  %v296_v42 = vld [vmem:[%s1870_s2] sm:$0xff]  ;;  %v297_v44 = vld [vmem:[%s1870_s2 + $0x8] sm:$0xff]  ;;  %v299_v47 = vld [vmem:[%s1870_s2 + $0x18] sm:$0xff] }
  0x36   : > { %405 = vmatpush1.msra.mxu0 %v266_v15  ;;  %369 = vperm.xlu0 %1271, %v307_v30   ;;  %v280_v43 = vld [vmem:[%s1869_s1] sm:$0xff]  ;;  %v281_v46 = vld [vmem:[%s1869_s1 + $0x8] sm:$0xff]  ;;  %v282_v49 = vld [vmem:[%s1869_s1 + $0x10] sm:$0xff] }
  0x37   : > { %406 = vmatprep.subr.mxu0 %v265_v16  ;;  %364 = vperm.xlu1 %1272, %v306_v32   ;;  %v300_v48 = vld [vmem:[%s1870_s2 + $0x20] sm:$0xff]  ;;  %v301_v50 = vld [vmem:[%s1870_s2 + $0x28] sm:$0xff]  ;;  %v302_v51 = vld [vmem:[%s1870_s2 + $0x30] sm:$0xff] }
  0x38   : > { %407 = vmatpush1.msra.mxu0 %v264_v17  ;;  %v283_v52 = vld [vmem:[%s1869_s1 + $0x18] sm:$0xff]  ;;  %v284_v54 = vld [vmem:[%s1869_s1 + $0x20] sm:$0xff]  ;;  %v285_v55 = vld [vmem:[%s1869_s1 + $0x28] sm:$0xff] }
  0x39   : > { %408 = vmatprep.subr.mxu0 %v263_v18  ;;  %v303_v53 = vld [vmem:[%s1870_s2 + $0x38] sm:$0xff]  ;;  %v286_v56 = vld [vmem:[%s1869_s1 + $0x30] sm:$0xff]  ;;  %v288_v58 = vld [vmem:[%s1869_s1 + $0x40] sm:$0xff] }
  0x3a   : > { %409 = vmatpush1.msra.mxu0 %v262_v19  ;;  %359 = vperm.xlu0 %1271, %v305_v36   ;;  %v287_v57 = vld [vmem:[%s1869_s1 + $0x38] sm:$0xff]  ;;  %v289_v59 = vld [vmem:[%s1869_s1 + $0x48] sm:$0xff]  ;;  %v290_v60 = vld [vmem:[%s1869_s1 + $0x50] sm:$0xff] }
  0x3b   : > { %410 = vmatprep.subr.mxu0 %v261_v21  ;;  %354 = vperm.xlu1 %1272, %v304_v38   ;;  %v291_v61 = vld [vmem:[%s1869_s1 + $0x58] sm:$0xff]  ;;  %v292_v62 = vld [vmem:[%s1869_s1 + $0x60] sm:$0xff]  ;;  %v293_v63 = vld [vmem:[%s1869_s1 + $0x68] sm:$0xff] }
  0x3c   : > { %411 = vmatpush1.msra.mxu0 %v260_v23  ;;  %v294_v1 = vld [vmem:[%s1869_s1 + $0x70] sm:$0xff]  ;;  %v295_v2 = vld [vmem:[%s1869_s1 + $0x78] sm:$0xff] }
  0x3d   : > { %412 = vmatprep.subr.mxu0 %v259_v25 }
  0x3e   : > { %413 = vmatpush1.msra.mxu0 %v258_v27  ;;  %314 = vperm.xlu0 %1271, %v296_v42  }
  0x3f   : > { %414 = vmatprep.subr.mxu0 %v257_v28  ;;  %319 = vperm.xlu1 %1272, %v297_v44  }
  0x40   : > { %415 = vmatpush1.msra.mxu0 %v256_v29 }
  0x41   : > { %416 = vmatprep.subr.mxu0 %v255_v31 }
  0x42   : > { %417 = vmatpush1.msra.mxu0 %v254_v33  ;;  %324 = vperm.xlu0 %1271, %v298_v45  }
  0x43   : > { %418 = vmatprep.subr.mxu0 %v253_v34  ;;  %329 = vperm.xlu1 %1272, %v299_v47  }
  0x44   : > { %419 = vmatpush1.msra.mxu0 %v252_v35 }
  0x45   : > { %420 = vmatprep.subr.mxu0 %v251_v37 }
  0x46   : > { %421 = vmatpush1.msra.mxu0 %v250_v39  ;;  %334 = vperm.xlu0 %1271, %v300_v48  }
  0x47   : > { %422 = vmatprep.subr.mxu0 %v249_v40  ;;  %339 = vperm.xlu1 %1272, %v301_v50  }
  0x48   : > { %423 = vmatpush1.msra.mxu0 %v248_v41 }
  0x49   : > { %457 = vmatmul.mubr.f32.vlgmr.msra.gmra.mxu0 %v280_v43 }
  0x4a   : > { %462 = vmatprep.mubr.f32.mxu0 %v1388_v0  ;;  %344 = vperm.xlu0 %1271, %v302_v51  }
  0x4b   : > { %349 = vperm.xlu1 %1272, %v303_v53  }
  0x4d   : > { %463 = vmatmul.mubr.f32.gmra.mxu0 %v281_v46 }
  0x4e   : > { %468 = vmatprep.mubr.f32.mxu0 %v1388_v0 }
  0x51   : > { %469 = vmatmul.mubr.f32.gmra.mxu0 %v282_v49 }
  0x52   : > { %474 = vmatprep.mubr.f32.mxu0 %v1388_v0 }
  0x55   : > { %475 = vmatmul.mubr.f32.gmra.mxu0 %v283_v52 }
  0x56   : > { %480 = vmatprep.mubr.f32.mxu0 %v1388_v0 }
  0x59   : > { %481 = vmatmul.mubr.f32.gmra.mxu0 %v284_v54 }
  0x5a   : > { %486 = vmatprep.mubr.f32.mxu0 %v1388_v0 }
  0x5d   : > { %487 = vmatmul.mubr.f32.gmra.mxu0 %v285_v55 }
  0x5e   : > { %492 = vmatprep.mubr.f32.mxu0 %v1388_v0 }
  0x61   : > { %493 = vmatmul.mubr.f32.gmra.mxu0 %v286_v56 }
  0x62   : > { %498 = vmatprep.mubr.f32.mxu0 %v1388_v0 }
  0x65   : > { %499 = vmatmul.mubr.f32.gmra.mxu0 %v287_v57 }
  0x66   : > { %504 = vmatprep.mubr.f32.mxu0 %v1388_v0 }
  0x69   : > { %505 = vmatmul.mubr.f32.gmra.mxu0 %v288_v58 }
  0x6a   : > { %510 = vmatprep.mubr.f32.mxu0 %v1388_v0 }
  0x6d   : > { %511 = vmatmul.mubr.f32.gmra.mxu0 %v289_v59 }
  0x6e   : > { %516 = vmatprep.mubr.f32.mxu0 %v1388_v0 }
  0x71   : > { %517 = vmatmul.mubr.f32.gmra.mxu0 %v290_v60 }
  0x72   : > { %522 = vmatprep.mubr.f32.mxu0 %v1388_v0 }
  0x75   : > { %523 = vmatmul.mubr.f32.gmra.mxu0 %v291_v61 }
  0x76   : > { %528 = vmatprep.mubr.f32.mxu0 %v1388_v0 }
  0x79   : > { %529 = vmatmul.mubr.f32.gmra.mxu0 %v292_v62 }
  0x7a   : > { %534 = vmatprep.mubr.f32.mxu0 %v1388_v0 }
  0x7d   : > { %535 = vmatmul.mubr.f32.gmra.mxu0 %v293_v63 }
  0x7e   : > { %540 = vmatprep.mubr.f32.mxu0 %v1388_v0 }
  0x81   : > { %541 = vmatmul.mubr.f32.gmra.mxu0 %v294_v1 }
  0x82   : > { %546 = vmatprep.mubr.f32.mxu0 %v1388_v0 }
  0x85   : > { %547 = vmatmul.mubr.f32.gmra.mxu0 %v295_v2 }
  0xa9   : > { %v390_v3 = vpop.permute.xlu0 %389 }
  0xaa   : > { %v380_v43 = vpop.permute.xlu1 %379 }
  0xad   : > { %v385_v4 = vpop.permute.xlu0 %384 }
  0xae   : > { %v375_v46 = vpop.permute.xlu1 %374 }
  0xb1   : > { %v1634_v5 = vpop.permute.xlu0 %369 }
  0xb2   : > { %v365_v51 = vpop.permute.xlu1 %364 }
  0xb5   : > { %v1636_v6 = vpop.permute.xlu0 %359 }
  0xb6   : > { %v355_v56 = vpop.permute.xlu1 %354 }
  0xb9   : > { %v1656_v8 = vpop.permute.xlu0 %314 }
  0xba   : > { %v320_v61 = vpop.permute.xlu1 %319 }
  0xbd   : > { %v325_v1 = vpop.permute.xlu0 %324 }
 0x109   : > { %v1654_v7 = vpop.f32.mrf.mxu0 }
 0x10a   : > { %v459_v60 = vadd.f32 %v1654_v7, %v1656_v8  ;;  %v335_v7 = vpop.permute.xlu0 %334 }
 0x10b   : > { %v460_v9 = vpop.f32.mrf.mxu0 }
 0x10c   : > { %v461_v10 = vadd.f32 %v460_v9, %v1656_v8 }
 0x10d   : > { %v1659_v11 = vpop.f32.mrf.mxu0 }
 0x10e   : > { %625 = vmatprep.mubr.f32.mxu1 %v461_v10  ;;  %v465_v63 = vadd.f32 %v1659_v11, %v320_v61 }
 0x10f   : > { %v1661_v12 = vpop.f32.mrf.mxu0 }
 0x110   : > { %v467_v62 = vadd.f32 %v1661_v12, %v320_v61 }
 0x111   : > { %v1663_v13 = vpop.f32.mrf.mxu0 }
 0x113   : > { %v1665_v14 = vpop.f32.mrf.mxu0 }
 0x114   : > { %v473_v2 = vadd.f32 %v1665_v14, %v325_v1 }
 0x115   : > { %v1667_v15 = vpop.f32.mrf.mxu0 }
 0x117   : > { %v1669_v16 = vpop.f32.mrf.mxu0 }
 0x119   : > { %v1671_v0 = vpop.f32.mrf.mxu0 }
 0x11a   : > { %v483_v9 = vadd.f32 %v1671_v0, %v335_v7 }
 0x11b   : > { %v1673_v17 = vpop.f32.mrf.mxu0 }
 0x11c   : > { %v485_v8 = vadd.f32 %v1673_v17, %v335_v7 }
 0x11d   : > { %v1675_v18 = vpop.f32.mrf.mxu0 }
 0x11f   : > { %v1677_v19 = vpop.f32.mrf.mxu0 }
 0x121   : > { %v1679_v20 = vpop.f32.mrf.mxu0 }
 0x123   : > { %v1681_v21 = vpop.f32.mrf.mxu0 }
 0x125   : > { %v1683_v22 = vpop.f32.mrf.mxu0 }
 0x127   : > { %v1685_v23 = vpop.f32.mrf.mxu0 }
 0x129   : > { %v506_v24 = vpop.f32.mrf.mxu0 }
 0x12a   : > { %v507_v59 = vadd.f32 %v506_v24, %v355_v56 }
 0x12b   : > { %v508_v25 = vpop.f32.mrf.mxu0 }
 0x12c   : > { %v509_v58 = vadd.f32 %v508_v25, %v355_v56 }
 0x12d   : > { %v512_v26 = vpop.f32.mrf.mxu0 }
 0x12e   : > { %v513_v57 = vadd.f32 %v512_v26, %v1636_v6 }
 0x12f   : > { %v514_v27 = vpop.f32.mrf.mxu0 }
 0x130   : > { %v515_v55 = vadd.f32 %v514_v27, %v1636_v6 }
 0x131   : > { %v518_v28 = vpop.f32.mrf.mxu0 }
 0x132   : > { %v519_v54 = vadd.f32 %v518_v28, %v365_v51 }
 0x133   : > { %v520_v29 = vpop.f32.mrf.mxu0 }
 0x134   : > { %v521_v53 = vadd.f32 %v520_v29, %v365_v51  ;;  %v555_v29 = vld [vmem:[#allocation2 + $0x10] sm:$0xff] }
 0x135   : > { %v524_v30 = vpop.f32.mrf.mxu0 }
 0x136   : > { %v525_v52 = vadd.f32 %v524_v30, %v1634_v5 }
 0x137   : > { %v526_v31 = vpop.f32.mrf.mxu0 }
 0x138   : > { %v527_v50 = vadd.f32 %v526_v31, %v1634_v5  ;;  %v556_v31 = vld [vmem:[#allocation2 + $0x18] sm:$0xff] }
 0x139   : > { %v530_v32 = vpop.f32.mrf.mxu0 }
 0x13a   : > { %v531_v49 = vadd.f32 %v530_v32, %v375_v46 }
 0x13b   : > { %v532_v33 = vpop.f32.mrf.mxu0 }
 0x13c   : > { %v533_v48 = vadd.f32 %v532_v33, %v375_v46  ;;  %v560_v46 = vld [vmem:[#allocation2 + $0x38] sm:$0xff] }
 0x13d   : > { %v536_v34 = vpop.f32.mrf.mxu0 }
 0x13e   : > { %v537_v47 = vadd.f32 %v536_v34, %v380_v43  ;;  %v557_v34 = vld [vmem:[#allocation2 + $0x20] sm:$0xff] }
 0x13f   : > { %v538_v35 = vpop.f32.mrf.mxu0 }
 0x140   : > { %v539_v45 = vadd.f32 %v538_v35, %v380_v43 }
 0x141   : > { %v542_v36 = vpop.f32.mrf.mxu0 }
 0x142   : > { %v543_v44 = vadd.f32 %v542_v36, %v385_v4 }
 0x143   : > { %v544_v37 = vpop.f32.mrf.mxu0 }
 0x144   : > { %v545_v42 = vadd.f32 %v544_v37, %v385_v4  ;;  %v330_v4 = vpop.permute.xlu1 %329 }
 0x145   : > { %v548_v38 = vpop.f32.mrf.mxu0  ;;  %v479_v5 = vadd.f32 %v1669_v16, %v330_v4  ;;  %v477_v6 = vadd.f32 %v1667_v15, %v330_v4 }
 0x146   : > { %v549_v41 = vadd.f32 %v548_v38, %v390_v3  ;;  %v558_v38 = vld [vmem:[#allocation2 + $0x28] sm:$0xff] }
 0x147   : > { %v550_v39 = vpop.f32.mrf.mxu0 }
 0x148   : > { %v551_v40 = vadd.f32 %v550_v39, %v390_v3  ;;  %v471_v3 = vadd.f32 %v1663_v13, %v325_v1  ;;  %v340_v10 = vpop.permute.xlu1 %339  ;;  %v345_v13 = vpop.permute.xlu0 %344 }
 0x149   : > { %v491_v11 = vadd.f32 %v1677_v19, %v340_v10  ;;  %v489_v12 = vadd.f32 %v1675_v18, %v340_v10  ;;  %v497_v14 = vadd.f32 %v1681_v21, %v345_v13  ;;  %v495_v15 = vadd.f32 %v1679_v20, %v345_v13  ;;  %v553_v19 = vld [vmem:[#allocation2] sm:$0xff]  ;;  %v554_v18 = vld [vmem:[#allocation2 + $0x8] sm:$0xff] }
 0x14a   : > { %577 = vmatprep.subr.mxu1 %v551_v40 }
 0x14b   : > { %578 = vmatpush1.xpose.msra.mxu1 %v549_v41 }
 0x14c   : > { %579 = vmatprep.subr.mxu1 %v545_v42  ;;  %v350_v16 = vpop.permute.xlu1 %349  ;;  %v559_v42 = vld [vmem:[#allocation2 + $0x30] sm:$0xff] }
 0x14d   : > { %v503_v17 = vadd.f32 %v1685_v23, %v350_v16  ;;  %v501_v0 = vadd.f32 %v1683_v22, %v350_v16 }
 0x14f   : > { %580 = vmatpush1.xpose.msra.mxu1 %v543_v44 }
 0x150   : > { %581 = vmatprep.subr.mxu1 %v539_v45 }
 0x153   : > { %582 = vmatpush1.xpose.msra.mxu1 %v537_v47 }
 0x154   : > { %583 = vmatprep.subr.mxu1 %v533_v48 }
 0x157   : > { %584 = vmatpush1.xpose.msra.mxu1 %v531_v49 }
 0x158   : > { %585 = vmatprep.subr.mxu1 %v527_v50 }
 0x15b   : > { %586 = vmatpush1.xpose.msra.mxu1 %v525_v52 }
 0x15c   : > { %587 = vmatprep.subr.mxu1 %v521_v53 }
 0x15f   : > { %588 = vmatpush1.xpose.msra.mxu1 %v519_v54 }
 0x160   : > { %589 = vmatprep.subr.mxu1 %v515_v55 }
 0x163   : > { %590 = vmatpush1.xpose.msra.mxu1 %v513_v57 }
 0x164   : > { %591 = vmatprep.subr.mxu1 %v509_v58 }
 0x167   : > { %592 = vmatpush1.xpose.msra.mxu1 %v507_v59 }
 0x16a   : > { %626 = vmatmul.mubr.f32.vlgmr.msra.gmra.mxu1 %v459_v60 }
 0x16b   : > { %630 = vmatprep.mubr.f32.mxu1 %v467_v62 }
 0x16e   : > { %631 = vmatmul.mubr.f32.gmra.mxu1 %v465_v63 }
 0x16f   : > { %635 = vmatprep.mubr.f32.mxu1 %v473_v2 }
 0x172   : > { %636 = vmatmul.mubr.f32.gmra.mxu1 %v471_v3 }
 0x173   : > { %640 = vmatprep.mubr.f32.mxu1 %v479_v5 }
 0x176   : > { %641 = vmatmul.mubr.f32.gmra.mxu1 %v477_v6 }
 0x177   : > { %645 = vmatprep.mubr.f32.mxu1 %v485_v8 }
 0x17a   : > { %646 = vmatmul.mubr.f32.gmra.mxu1 %v483_v9 }
 0x17b   : > { %650 = vmatprep.mubr.f32.mxu1 %v491_v11 }
 0x17e   : > { %651 = vmatmul.mubr.f32.gmra.mxu1 %v489_v12 }
 0x17f   : > { %655 = vmatprep.mubr.f32.mxu1 %v497_v14 }
 0x182   : > { %656 = vmatmul.mubr.f32.gmra.mxu1 %v495_v15 }
 0x183   : > { %660 = vmatprep.mubr.f32.mxu1 %v503_v17 }
 0x186   : > { %661 = vmatmul.mubr.f32.gmra.mxu1 %v501_v0 }
 0x22a   : > { %v627_v24 = vpop.f32.mrf.mxu1 }
 0x22b   : > { %v666_v25 = vadd.f32 %v627_v24, %v553_v19 }
 0x22c   : > { %v629_v26 = vpop.f32.mrf.mxu1 }
 0x22d   : > { %675 = vst.msk [vmem:[#allocation2] sm:$0xff] %vm239_vm0, %v666_v25 }
 0x22e   : > { %v632_v21 = vpop.f32.mrf.mxu1 }
 0x22f   : > { %v667_v27 = vadd.f32 %v632_v21, %v554_v18 }
 0x230   : > { %v634_v28 = vpop.f32.mrf.mxu1 }
 0x231   : > { %676 = vst.msk [vmem:[#allocation2 + $0x8] sm:$0xff] %vm239_vm0, %v667_v27 }
 0x232   : > { %v637_v20 = vpop.f32.mrf.mxu1 }
 0x233   : > { %v668_v23 = vadd.f32 %v637_v20, %v555_v29 }
 0x234   : > { %v639_v30 = vpop.f32.mrf.mxu1  ;;  %v686_v1 = vld [vmem:[#allocation2] sm:$0xff] }
 0x235   : > { %677 = vst.msk [vmem:[#allocation2 + $0x10] sm:$0xff] %vm239_vm0, %v668_v23  ;;  %v694_v2 = vsel %vm239_vm0, %v686_v1, -inf }
 0x236   : > { %v642_v22 = vpop.f32.mrf.mxu1 }
 0x237   : > { %v669_v32 = vadd.f32 %v642_v22, %v556_v31 }
 0x238   : > { %v644_v33 = vpop.f32.mrf.mxu1  ;;  %v687_v57 = vld [vmem:[#allocation2 + $0x8] sm:$0xff] }
 0x239   : > { %678 = vst.msk [vmem:[#allocation2 + $0x18] sm:$0xff] %vm239_vm0, %v669_v32  ;;  %v697_v59 = vsel %vm239_vm0, %v687_v57, -inf }
 0x23a   : > { %v647_v35 = vpop.f32.mrf.mxu1 }
 0x23b   : > { %v670_v36 = vadd.f32 %v647_v35, %v557_v34 }
 0x23c   : > { %v649_v37 = vpop.f32.mrf.mxu1  ;;  %v688_v62 = vld [vmem:[#allocation2 + $0x10] sm:$0xff] }
 0x23d   : > { %679 = vst.msk [vmem:[#allocation2 + $0x20] sm:$0xff] %vm239_vm0, %v670_v36  ;;  %v700_v63 = vsel %vm239_vm0, %v688_v62, -inf }
 0x23e   : > { %v652_v39 = vpop.f32.mrf.mxu1 }
 0x23f   : > { %v671_v40 = vadd.f32 %v652_v39, %v558_v38 }
 0x240   : > { %v654_v41 = vpop.f32.mrf.mxu1  ;;  %v689_v52 = vld [vmem:[#allocation2 + $0x18] sm:$0xff] }
 0x241   : > { %680 = vst.msk [vmem:[#allocation2 + $0x28] sm:$0xff] %vm239_vm0, %v671_v40  ;;  %v703_v55 = vsel %vm239_vm0, %v689_v52, -inf }
 0x242   : > { %v657_v43 = vpop.f32.mrf.mxu1 }
 0x243   : > { %v672_v44 = vadd.f32 %v657_v43, %v559_v42  ;;  %v782_v42 = vld [vmem:[%s1871_s3] sm:$0xff] }
 0x244   : > { %v659_v45 = vpop.f32.mrf.mxu1  ;;  %v690_v60 = vld [vmem:[#allocation2 + $0x20] sm:$0xff]  ;;  %1188 = vmatprep.mubr.msk.f32.mxu1 %vm239_vm0, %v782_v42 }
 0x245   : > { %681 = vst.msk [vmem:[#allocation2 + $0x30] sm:$0xff] %vm239_vm0, %v672_v44  ;;  %v706_v61 = vsel %vm239_vm0, %v690_v60, -inf }
 0x246   : > { %v662_v47 = vpop.f32.mrf.mxu1 }
 0x247   : > { %v673_v48 = vadd.f32 %v662_v47, %v560_v46 }
 0x248   : > { %v664_v49 = vpop.f32.mrf.mxu1  ;;  %v691_v56 = vld [vmem:[#allocation2 + $0x28] sm:$0xff] }
 0x249   : > { %682 = vst.msk [vmem:[#allocation2 + $0x38] sm:$0xff] %vm239_vm0, %v673_v48  ;;  %v709_v58 = vsel %vm239_vm0, %v691_v56, -inf }
 0x24c   : > { %v692_v50 = vld [vmem:[#allocation2 + $0x30] sm:$0xff] }
 0x24d   : > { %v712_v51 = vsel %vm239_vm0, %v692_v50, -inf }
 0x24e   : > { %713 = vmax.xlane.f32.xlu1 %v712_v51 }
 0x250   : > { %v693_v53 = vld [vmem:[#allocation2 + $0x38] sm:$0xff] }
 0x251   : > { %v715_v54 = vsel %vm239_vm0, %v693_v53, -inf }
 0x252   : > { %716 = vmax.xlane.f32.xlu0 %v715_v54  ;;  %704 = vmax.xlane.f32.xlu1 %v703_v55 }
 0x256   : > { %710 = vmax.xlane.f32.xlu0 %v709_v58  ;;  %698 = vmax.xlane.f32.xlu1 %v697_v59 }
 0x25a   : > { %707 = vmax.xlane.f32.xlu0 %v706_v61 }
 0x25e   : > { %701 = vmax.xlane.f32.xlu0 %v700_v63 }
 0x262   : > { %695 = vmax.xlane.f32.xlu0 %v694_v2 }
 0x2d7   : > { %v714_v3 = vpop.xlane.xlu1 %713 }
 0x2d8   : > { %v724_v4 = vsub.f32 %v692_v50, %v714_v3 }
 0x2da   : > { %v738_v5 = vmul.f32 1.442695, %v724_v4  ;;  %v783_v4 = vld [vmem:[%s1871_s3 + $0x8] sm:$0xff] }
 0x2db   : > { %v717_v6 = vpop.xlane.xlu0 %716  ;;  %v705_v7 = vpop.xlane.xlu1 %704 }
 0x2dc   : > { %1273 = vpow2.f32 %v738_v5  ;;  %v725_v8 = vsub.f32 %v693_v53, %v717_v6  ;;  %v721_v10 = vsub.f32 %v689_v52, %v705_v7  ;;  %v784_v5 = vld [vmem:[%s1871_s3 + $0x10] sm:$0xff]  ;;  %v785_v6 = vld [vmem:[%s1871_s3 + $0x18] sm:$0xff]  ;;  %v786_v7 = vld [vmem:[%s1871_s3 + $0x20] sm:$0xff] }
 0x2de   : > { %v740_v9 = vmul.f32 1.442695, %v725_v8  ;;  %v732_v14 = vmul.f32 1.442695, %v721_v10  ;;  %v787_v8 = vld [vmem:[%s1871_s3 + $0x28] sm:$0xff]  ;;  %v789_v10 = vld [vmem:[%s1871_s3 + $0x38] sm:$0xff] }
 0x2df   : > { %v711_v11 = vpop.xlane.xlu0 %710  ;;  %v699_v12 = vpop.xlane.xlu1 %698 }
 0x2e0   : > { %1275 = vpow2.f32 %v740_v9  ;;  %v723_v13 = vsub.f32 %v691_v56, %v711_v11  ;;  %v719_v16 = vsub.f32 %v687_v57, %v699_v12  ;;  %v788_v9 = vld [vmem:[%s1871_s3 + $0x30] sm:$0xff]  ;;  %v790_v11 = vld [vmem:[%s1871_s3 + $0x40] sm:$0xff]  ;;  %v791_v12 = vld [vmem:[%s1871_s3 + $0x48] sm:$0xff] }
 0x2e2   : > { %v736_v15 = vmul.f32 1.442695, %v723_v13  ;;  %v728_v19 = vmul.f32 1.442695, %v719_v16  ;;  %v792_v13 = vld [vmem:[%s1871_s3 + $0x50] sm:$0xff]  ;;  %v795_v16 = vld [vmem:[%s1871_s3 + $0x68] sm:$0xff] }
 0x2e3   : > { %v708_v17 = vpop.xlane.xlu0 %707 }
 0x2e4   : > { %1277 = vpow2.f32 %v736_v15  ;;  %v722_v0 = vsub.f32 %v690_v60, %v708_v17  ;;  %v794_v15 = vld [vmem:[%s1871_s3 + $0x60] sm:$0xff]  ;;  %v796_v17 = vld [vmem:[%s1871_s3 + $0x70] sm:$0xff] }
 0x2e5   : > { %1279 = vpow2.f32 %v732_v14  ;;  %v793_v14 = vld [vmem:[%s1871_s3 + $0x58] sm:$0xff] }
 0x2e6   : > { %v734_v24 = vmul.f32 1.442695, %v722_v0  ;;  %v797_v0 = vld [vmem:[%s1871_s3 + $0x78] sm:$0xff] }
 0x2e7   : > { %v702_v25 = vpop.xlane.xlu0 %701 }
 0x2e8   : > { %1281 = vpow2.f32 %v734_v24  ;;  %v720_v26 = vsub.f32 %v688_v62, %v702_v25 }
 0x2e9   : > { %v1274_v18 = vpop.eup %1273  ;;  %1283 = vpow2.f32 %v728_v19 }
 0x2ea   : > { %v730_v21 = vmul.f32 1.442695, %v720_v26  ;;  %v760_v27 = vsel %vm239_vm0, %v1274_v18, 0.0 }
 0x2eb   : > { %761 = vadd.xlane.f32.xlu0 %v760_v27  ;;  %v696_v28 = vpop.xlane.xlu0 %695 }
 0x2ec   : > { %1285 = vpow2.f32 %v730_v21  ;;  %v718_v29 = vsub.f32 %v686_v1, %v696_v28 }
 0x2ed   : > { %v1276_v20 = vpop.eup %1275 }
 0x2ee   : > { %v726_v23 = vmul.f32 1.442695, %v718_v29  ;;  %v763_v30 = vsel %vm239_vm0, %v1276_v20, 0.0 }
 0x2ef   : > { %764 = vadd.xlane.f32.xlu1 %v763_v30 }
 0x2f0   : > { %1287 = vpow2.f32 %v726_v23 }
 0x2f1   : > { %v1278_v31 = vpop.eup %1277 }
 0x2f2   : > { %v757_v22 = vsel %vm239_vm0, %v1278_v31, 0.0  ;;  %v1280_v32 = vpop.eup %1279 }
 0x2f3   : > { %758 = vadd.xlane.f32.xlu1 %v757_v22  ;;  %v751_v34 = vsel %vm239_vm0, %v1280_v32, 0.0 }
 0x2f5   : > { %v1282_v33 = vpop.eup %1281 }
 0x2f6   : > { %v754_v35 = vsel %vm239_vm0, %v1282_v33, 0.0  ;;  %v1284_v36 = vpop.eup %1283 }
 0x2f7   : > { %752 = vadd.xlane.f32.xlu1 %v751_v34  ;;  %755 = vadd.xlane.f32.xlu0 %v754_v35  ;;  %v745_v38 = vsel %vm239_vm0, %v1284_v36, 0.0 }
 0x2f9   : > { %v1286_v37 = vpop.eup %1285 }
 0x2fa   : > { %v748_v39 = vsel %vm239_vm0, %v1286_v37, 0.0 }
 0x2fb   : > { %746 = vadd.xlane.f32.xlu1 %v745_v38  ;;  %749 = vadd.xlane.f32.xlu0 %v748_v39 }
 0x2fd   : > { %v1288_v40 = vpop.eup %1287 }
 0x2fe   : > { %v742_v41 = vsel %vm239_vm0, %v1288_v40, 0.0 }
 0x2ff   : > { %743 = vadd.xlane.f32.xlu0 %v742_v41 }
 0x374   : > { %v762_v43 = vpop.xlane.xlu0 %761 }
 0x375   : > { %1289 = vrcp.f32 %v762_v43 }
 0x378   : > { %v765_v44 = vpop.xlane.xlu1 %764 }
 0x379   : > { %1291 = vrcp.f32 %v765_v44 }
 0x37c   : > { %v759_v45 = vpop.xlane.xlu1 %758 }
 0x37d   : > { %1293 = vrcp.f32 %v759_v45 }
 0x380   : > { %v756_v46 = vpop.xlane.xlu0 %755  ;;  %v753_v47 = vpop.xlane.xlu1 %752 }
 0x381   : > { %1295 = vrcp.f32 %v756_v46 }
 0x382   : > { %v1290_v48 = vpop.eup %1289  ;;  %1297 = vrcp.f32 %v753_v47 }
 0x383   : > { %v780_v52 = vmul.f32 %v1290_v48, %v1274_v18 }
 0x384   : > { %v750_v50 = vpop.xlane.xlu0 %749  ;;  %v747_v54 = vpop.xlane.xlu1 %746 }
 0x385   : > { %1299 = vrcp.f32 %v750_v50 }
 0x386   : > { %v1292_v49 = vpop.eup %1291  ;;  %1301 = vrcp.f32 %v747_v54 }
 0x387   : > { %v781_v51 = vmul.f32 %v1292_v49, %v1276_v20 }
 0x388   : > { %v744_v56 = vpop.xlane.xlu0 %743 }
 0x389   : > { %1172 = vmatprep.subr.msk.mxu1 %vm239_vm0, %v781_v51  ;;  %1303 = vrcp.f32 %v744_v56 }
 0x38a   : > { %v1294_v53 = vpop.eup %1293  ;;  %1173 = vmatpush3.xpose.msk.msra.mxu1 %vm239_vm0, %v781_v51 }
 0x38b   : > { %1174 = vmatprep.subr.msk.mxu1 %vm239_vm0, %v780_v52  ;;  %v779_v55 = vmul.f32 %v1294_v53, %v1278_v31 }
 0x38e   : > { %1175 = vmatpush3.xpose.msk.msra.mxu1 %vm239_vm0, %v780_v52  ;;  %v1296_v57 = vpop.eup %1295 }
 0x38f   : > { %1176 = vmatprep.subr.msk.mxu1 %vm239_vm0, %v779_v55  ;;  %v778_v58 = vmul.f32 %v1296_v57, %v1282_v33  ;;  %v1298_v59 = vpop.eup %1297 }
 0x390   : > { %v777_v60 = vmul.f32 %v1298_v59, %v1280_v32 }
 0x392   : > { %1177 = vmatpush3.xpose.msk.msra.mxu1 %vm239_vm0, %v779_v55  ;;  %v1300_v61 = vpop.eup %1299 }
 0x393   : > { %1178 = vmatprep.subr.msk.mxu1 %vm239_vm0, %v778_v58  ;;  %v776_v62 = vmul.f32 %v1300_v61, %v1286_v37  ;;  %v1302_v63 = vpop.eup %1301 }
 0x394   : > { %v775_v1 = vmul.f32 %v1302_v63, %v1284_v36 }
 0x396   : > { %1179 = vmatpush3.xpose.msk.msra.mxu1 %vm239_vm0, %v778_v58  ;;  %v1304_v2 = vpop.eup %1303 }
 0x397   : > { %1180 = vmatprep.subr.msk.mxu1 %vm239_vm0, %v777_v60  ;;  %v774_v3 = vmul.f32 %v1304_v2, %v1288_v40 }
 0x39a   : > { %1181 = vmatpush3.xpose.msk.msra.mxu1 %vm239_vm0, %v777_v60 }
 0x39b   : > { %1182 = vmatprep.subr.msk.mxu1 %vm239_vm0, %v776_v62 }
 0x39e   : > { %1183 = vmatpush3.xpose.msk.msra.mxu1 %vm239_vm0, %v776_v62 }
 0x39f   : > { %1184 = vmatprep.subr.msk.mxu1 %vm239_vm0, %v775_v1 }
 0x3a2   : > { %1185 = vmatpush3.xpose.msk.msra.mxu1 %vm239_vm0, %v775_v1 }
 0x3a3   : > { %1186 = vmatprep.subr.msk.mxu1 %vm239_vm0, %v774_v3 }
 0x3a6   : > { %1187 = vmatpush3.xpose.msk.msra.mxu1 %vm239_vm0, %v774_v3 }
 0x3a9   : > { %1189 = vmatmul.mubr.msk.f32.vlgmr.msra.gmra.mxu1 %vm239_vm0, %v783_v4 }
 0x3aa   : > { %1191 = vmatprep.mubr.msk.f32.mxu1 %vm239_vm0, %v784_v5 }
 0x3ad   : > { %1192 = vmatmul.mubr.msk.f32.gmra.mxu1 %vm239_vm0, %v785_v6 }
 0x3ae   : > { %1194 = vmatprep.mubr.msk.f32.mxu1 %vm239_vm0, %v786_v7 }
 0x3b1   : > { %1195 = vmatmul.mubr.msk.f32.gmra.mxu1 %vm239_vm0, %v787_v8 }
 0x3b2   : > { %1197 = vmatprep.mubr.msk.f32.mxu1 %vm239_vm0, %v788_v9 }
 0x3b5   : > { %1198 = vmatmul.mubr.msk.f32.gmra.mxu1 %vm239_vm0, %v789_v10 }
 0x3b6   : > { %1200 = vmatprep.mubr.msk.f32.mxu1 %vm239_vm0, %v790_v11 }
 0x3b9   : > { %1201 = vmatmul.mubr.msk.f32.gmra.mxu1 %vm239_vm0, %v791_v12 }
 0x3ba   : > { %1203 = vmatprep.mubr.msk.f32.mxu1 %vm239_vm0, %v792_v13 }
 0x3bd   : > { %1204 = vmatmul.mubr.msk.f32.gmra.mxu1 %vm239_vm0, %v793_v14 }
 0x3be   : > { %1206 = vmatprep.mubr.msk.f32.mxu1 %vm239_vm0, %v794_v15 }
 0x3c1   : > { %1207 = vmatmul.mubr.msk.f32.gmra.mxu1 %vm239_vm0, %v795_v16 }
 0x3c2   : > { %1209 = vmatprep.mubr.msk.f32.mxu1 %vm239_vm0, %v796_v17 }
 0x3c5   : > { %1210 = vmatmul.mubr.msk.f32.gmra.mxu1 %vm239_vm0, %v797_v0 }
 0x469   : > { %v1190_v19 = vpop.f32.mrf.mxu1 }
 0x46a   : > { %1016 = vst.msk [vmem:[%s1816_s7 + $0x8] sm:$0xff] %vm239_vm0, %v1190_v19 }
 0x46b   : > { %v936_v24 = vpop.f32.mrf.mxu1 }
 0x46c   : > { %1015 = vst.msk [vmem:[%s1816_s7] sm:$0xff] %vm239_vm0, %v936_v24 }
 0x46d   : > { %v1193_v25 = vpop.f32.mrf.mxu1 }
 0x46e   : > { %1018 = vst.msk [vmem:[%s1816_s7 + $0x18] sm:$0xff] %vm239_vm0, %v1193_v25 }
 0x46f   : > { %v946_v26 = vpop.f32.mrf.mxu1 }
 0x470   : > { %1017 = vst.msk [vmem:[%s1816_s7 + $0x10] sm:$0xff] %vm239_vm0, %v946_v26 }
 0x471   : > { %v1196_v18 = vpop.f32.mrf.mxu1 }
 0x472   : > { %1020 = vst.msk [vmem:[%s1816_s7 + $0x28] sm:$0xff] %vm239_vm0, %v1196_v18 }
 0x473   : > { %v956_v21 = vpop.f32.mrf.mxu1 }
 0x474   : > { %1019 = vst.msk [vmem:[%s1816_s7 + $0x20] sm:$0xff] %vm239_vm0, %v956_v21 }
 0x475   : > { %v1199_v27 = vpop.f32.mrf.mxu1 }
 0x476   : > { %1022 = vst.msk [vmem:[%s1816_s7 + $0x38] sm:$0xff] %vm239_vm0, %v1199_v27 }
 0x477   : > { %v966_v28 = vpop.f32.mrf.mxu1 }
 0x478   : > { %1021 = vst.msk [vmem:[%s1816_s7 + $0x30] sm:$0xff] %vm239_vm0, %v966_v28 }
 0x479   : > { %v1202_v29 = vpop.f32.mrf.mxu1 }
 0x47a   : > { %1024 = vst.msk [vmem:[%s1816_s7 + $0x48] sm:$0xff] %vm239_vm0, %v1202_v29 }
 0x47b   : > { %v976_v20 = vpop.f32.mrf.mxu1 }
 0x47c   : > { %1023 = vst.msk [vmem:[%s1816_s7 + $0x40] sm:$0xff] %vm239_vm0, %v976_v20 }
 0x47d   : > { %v1205_v23 = vpop.f32.mrf.mxu1 }
 0x47e   : > { %1026 = vst.msk [vmem:[%s1816_s7 + $0x58] sm:$0xff] %vm239_vm0, %v1205_v23 }
 0x47f   : > { %v986_v30 = vpop.f32.mrf.mxu1 }
 0x480   : > { %1025 = vst.msk [vmem:[%s1816_s7 + $0x50] sm:$0xff] %vm239_vm0, %v986_v30 }
 0x481   : > { %v1208_v31 = vpop.f32.mrf.mxu1 }
 0x482   : > { %1028 = vst.msk [vmem:[%s1816_s7 + $0x68] sm:$0xff] %vm239_vm0, %v1208_v31 }
 0x483   : > { %v996_v22 = vpop.f32.mrf.mxu1 }
 0x484   : > { %1027 = vst.msk [vmem:[%s1816_s7 + $0x60] sm:$0xff] %vm239_vm0, %v996_v22 }
 0x485   : > { %v1211_v32 = vpop.f32.mrf.mxu1 }
 0x486   : > { %1030 = vst.msk [vmem:[%s1816_s7 + $0x78] sm:$0xff] %vm239_vm0, %v1211_v32 }
 0x487   : > { %v1006_v33 = vpop.f32.mrf.mxu1 }
 0x488   : > { %1029 = vst.msk [vmem:[%s1816_s7 + $0x70] sm:$0xff] %vm239_vm0, %v1006_v33 }
 0x489 PF: > { %s17_s20 = sadd.s32 1, %s1383_s20   ;;  %s1876_s15 = smov %s1367_s16 }
 0x48a   : > { %p14_p8 = scmp.ge.s32.totalorder %s17_s20, 4   ;;  %s1877_s16 = smov %s1371_s17 }
 0x48b   : > { %s1878_s17 = smov %s1464_s27  ;;  %s1879_s18 = smov %s1379_s19 }
 0x48c   : > { %s1880_s19 = smov %s1882_s22  ;;  %16 = sbr.rel (!%p14_p8) target bundleno = 4 (0x4), region = 84 }
 0x491   :  { %1052 = vsyncpa [#allocation4], 1 }
 0x492   :  { %1054 = vsyncpa [#allocation4 + $0x1], 1 }

</bundles_post_ra>
